<compile_context>
chip_gen: v7x
topology: tpu7x:2x2x1
jax: 0.10.0
libtpu: 0.0.40
codegen_flags: <defaults>
</compile_context>

<pallas_src>
import functools

import jax
import jax.numpy as jnp
from jax.experimental import pallas as pl
from jax.experimental.pallas import tpu as pltpu

BN_EPS = 1e-5
_TM_MAX = 512                    # rows per M tile (512 ~= 1024 on the HBM roofline, half the
                                 # VMEM, and more M tiles for v7x megacore sharding)
_VMEM_LIMIT = 48 * 1024 * 1024   # safe on v5e/v6e (128 MiB) and v7x (64 MiB); actual use <~20 MiB


def _round_up(n, m):
    return ((n + m - 1) // m) * m


def _pick_m_tile(m, align):
    """(padded_m, tile) with padded_m % tile == 0 and tile % align == 0."""
    m_pad = _round_up(m, align)
    if m_pad <= _TM_MAX:
        return m_pad, m_pad
    return _round_up(m, _TM_MAX), _TM_MAX


# ---------------------------------------------------------------------------
# Pallas kernels
# ---------------------------------------------------------------------------

def _mm_stats_kernel(a_ref, b_ref, o_ref, sum_ref, ssq_ref):
    """(tm, Kd) @ (Kd, Co) MXU matmul, bf16 operands / f32 accumulation.

    B is fully VMEM-resident (no K grid axis, no accumulator scratch).  The conv
    tile is stored in bf16 (halves inter-layer HBM traffic); per-tile channel
    sum / sum-of-squares come from the f32 accumulator so training-mode
    BatchNorm statistics keep full precision.  Stats are per-(class, M-tile)
    outputs, so both grid axes are parallel-safe (megacore-friendly).
    """
    acc = jnp.dot(a_ref[0], b_ref[0], preferred_element_type=jnp.float32)
    o_ref[0] = acc.astype(o_ref.dtype)
    sum_ref[...] = jnp.sum(acc, axis=0, keepdims=True)[None, None]
    ssq_ref[...] = jnp.sum(acc * acc, axis=0, keepdims=True)[None, None]


def _mm_tanh_t_kernel(bt_ref, a_ref, o_ref):
    """Final layer: out^T = B^T @ A^T (NT contraction) with fused f32 tanh.

    Cout (=3, padded to 16) sits on the sublane axis and M on the lane axis, so
    the store is lane-dense bf16 instead of a 128-lane-padded f32 slab.
    """
    acc = jax.lax.dot_general(
        bt_ref[0], a_ref[0],
        dimension_numbers=(((1,), (1,)), ((), ())),   # contract Kd on both
        preferred_element_type=jnp.float32)           # (co_pad, tm)
    o_ref[0] = jnp.tanh(acc).astype(o_ref.dtype)


# ---------------------------------------------------------------------------
# Pallas wrappers
# ---------------------------------------------------------------------------

def _matmul_stats(a, b):
    """a: (G, M, Kd), b: (G, Kd, Co).  Returns (out[G, M, Co] bf16,
    chan_sum[Co] f32, chan_ssq[Co] f32); sums run over G and M (padded rows are
    zero so they contribute nothing)."""
    g, m, kd = a.shape
    co = b.shape[2]
    m_pad, tm = _pick_m_tile(m, 16)
    kd_pad = _round_up(kd, 128)
    co_pad = _round_up(co, 128)
    a = jnp.pad(a, ((0, 0), (0, m_pad - m), (0, kd_pad - kd))).astype(jnp.bfloat16)
    b = jnp.pad(b, ((0, 0), (0, kd_pad - kd), (0, co_pad - co))).astype(jnp.bfloat16)
    m_steps = m_pad // tm

    out, sums, ssqs = pl.pallas_call(
        _mm_stats_kernel,
        out_shape=(
            jax.ShapeDtypeStruct((g, m_pad, co_pad), jnp.bfloat16),
            jax.ShapeDtypeStruct((g, m_steps, 1, co_pad), jnp.float32),
            jax.ShapeDtypeStruct((g, m_steps, 1, co_pad), jnp.float32),
        ),
        grid_spec=pltpu.PrefetchScalarGridSpec(
            num_scalar_prefetch=0,
            grid=(g, m_steps),
            in_specs=[
                pl.BlockSpec((1, tm, kd_pad), lambda c, i: (c, i, 0)),
                # weights fully VMEM-resident per class (refetched only on class change)
                pl.BlockSpec((1, kd_pad, co_pad), lambda c, i: (c, 0, 0)),
            ],
            out_specs=(
                pl.BlockSpec((1, tm, co_pad), lambda c, i: (c, i, 0)),
                pl.BlockSpec((1, 1, 1, co_pad), lambda c, i: (c, i, 0, 0)),
                pl.BlockSpec((1, 1, 1, co_pad), lambda c, i: (c, i, 0, 0)),
            ),
        ),
        compiler_params=pltpu.CompilerParams(
            dimension_semantics=("parallel", "parallel"),
            vmem_limit_bytes=_VMEM_LIMIT),
    )(a, b)

    chan_sum = jnp.sum(sums[..., :co], axis=(0, 1, 2))
    chan_ssq = jnp.sum(ssqs[..., :co], axis=(0, 1, 2))
    return out[:, :m, :co], chan_sum, chan_ssq


def _matmul_tanh_t(a, bt):
    """a: (G, M, Kd), bt: (G, Co, Kd).  Returns tanh(B^T A^T): (G, Co, M) bf16."""
    g, m, kd = a.shape
    co = bt.shape[1]
    m_pad, tm = _pick_m_tile(m, 128)     # M is the lane axis of the transposed output
    kd_pad = _round_up(kd, 128)
    co_pad = _round_up(co, 16)           # Cout on the sublane axis (bf16 tile = 16)
    a = jnp.pad(a, ((0, 0), (0, m_pad - m), (0, kd_pad - kd))).astype(jnp.bfloat16)
    bt = jnp.pad(bt, ((0, 0), (0, co_pad - co), (0, kd_pad - kd))).astype(jnp.bfloat16)
    m_steps = m_pad // tm

    out_t = pl.pallas_call(
        _mm_tanh_t_kernel,
        out_shape=jax.ShapeDtypeStruct((g, co_pad, m_pad), jnp.bfloat16),
        grid_spec=pltpu.PrefetchScalarGridSpec(
            num_scalar_prefetch=0,
            grid=(g, m_steps),
            in_specs=[
                pl.BlockSpec((1, co_pad, kd_pad), lambda c, i: (c, 0, 0)),  # B^T resident
                pl.BlockSpec((1, tm, kd_pad), lambda c, i: (c, i, 0)),
            ],
            out_specs=pl.BlockSpec((1, co_pad, tm), lambda c, i: (c, 0, i)),
        ),
        compiler_params=pltpu.CompilerParams(
            dimension_semantics=("parallel", "parallel"),
            vmem_limit_bytes=_VMEM_LIMIT),
    )(bt, a)
    return out_t[:, :co, :m]


# ---------------------------------------------------------------------------
# ConvTranspose2d -> matmul operands (NHWC activations, PyTorch weight layout)
# ---------------------------------------------------------------------------

def _deconv1x1_operands(x, w):
    """ConvTranspose2d(stride=1, pad=0, K) on a 1x1 spatial input == plain matmul.

    x: (N, 1, 1, Cin) NHWC; w: (Cin, Cout, K, K).  A = (N, Cin);
    B = (Cin, K*K*Cout) with columns ordered (ky, kx, co) so the matmul output
    reshapes directly to NHWC (N, K, K, Cout).
    """
    n, hh, ww, cin = x.shape
    assert hh == 1 and ww == 1
    cout, k = w.shape[1], w.shape[2]
    a = x.reshape(n, cin)
    b = jnp.transpose(w, (0, 2, 3, 1)).reshape(cin, k * k * cout)
    return a[None], b[None], (k, cout)


# output parity -> kernel-tap indices for padded-window offsets (a, b) in (0, 1)
_SUBPIX_TAPS = {0: (3, 1), 1: (2, 0)}


def _deconv_s2_operands(x, w):
    """Sub-pixel decomposition of ConvTranspose2d(stride=2, pad=1, K=4).

    Output-parity class (ey, ex) owns output pixels (2j+ey, 2i+ex) and equals an
    ordinary 2x2 conv of the 1-padded input with a 2x2 slice of the 4x4 kernel:
        out[(ey,ex)][j, i] = sum_{a,b} w[:, :, taps[ey][a], taps[ex][b]] * xp[j+ey+a, i+ex+b]
    so the zero-dilated im2col is never built.

    x: (N, H, W, Cin) NHWC; w: (Cin, Cout, 4, 4).
    Returns A (4, N*H*W, 4*Cin), B (4, 4*Cin, Cout), classes ordered (ey, ex).
    """
    # TODO(synk): gather the 2x2 windows per M-tile inside the kernel
    # (memory_space=pl.ANY + pltpu.make_async_copy) instead of materializing the
    # 4x-expanded A matrix in HBM — the largest remaining win on mem-bound layers.
    n, hh, ww, cin = x.shape
    cout, k = w.shape[1], w.shape[2]
    assert k == 4, "DCGAN generator uses 4x4 transposed-conv kernels"
    xp = jnp.pad(x, ((0, 0), (1, 1), (1, 1), (0, 0)))
    a_cls, b_cls = [], []
    for ey in (0, 1):
        for ex in (0, 1):
            wins = [xp[:, ey + a:ey + a + hh, ex + b:ex + b + ww, :]
                    for a in (0, 1) for b in (0, 1)]
            a_cls.append(jnp.stack(wins, axis=3).reshape(n * hh * ww, 4 * cin))
            taps = [w[:, :, _SUBPIX_TAPS[ey][a], _SUBPIX_TAPS[ex][b]]
                    for a in (0, 1) for b in (0, 1)]
            b_cls.append(jnp.stack(taps, axis=0).reshape(4 * cin, cout))
    return jnp.stack(a_cls), jnp.stack(b_cls)


def _interleave_classes_nhwc(cls_out, n, hh, ww, cout):
    """cls_out: (4, N*H*W, Cout) ordered (ey, ex) -> NHWC (N, 2H, 2W, Cout)."""
    y = cls_out.reshape(2, 2, n, hh, ww, cout)
    y = jnp.transpose(y, (2, 3, 0, 4, 1, 5))          # (N, H, ey, W, ex, C)
    return y.reshape(n, 2 * hh, 2 * ww, cout)


# ---------------------------------------------------------------------------
# Generator forward
# ---------------------------------------------------------------------------

def generator_forward(x, params):
    """x: (N, nz, 1, 1) f32 NCHW.  Returns (N, nc, 64, 64) f32 NCHW in [-1, 1]."""
    n = x.shape[0]
    h = jnp.transpose(x, (0, 2, 3, 1)).astype(jnp.bfloat16)   # NHWC; bf16 feeds the MXU
    for layer in params:
        w = layer["w"]
        cout = w.shape[1]
        if not layer["bn"]:
            # Final layer: stride-2 ConvTranspose + Tanh, emitted transposed (C, M)
            # so the biggest write is lane-dense and already NCHW-ordered.
            hh, ww = h.shape[1], h.shape[2]
            a, b = _deconv_s2_operands(h, w)
            out_t = _matmul_tanh_t(a, jnp.transpose(b, (0, 2, 1)))   # (4, Cout, N*H*W)
            y = out_t.reshape(2, 2, cout, n, hh, ww)
            y = jnp.transpose(y, (3, 2, 4, 0, 5, 1)).reshape(n, cout, 2 * hh, 2 * ww)
            return y.astype(jnp.float32)

        if layer["stride"] == 1:                      # layer 1: 1x1 spatial input
            a, b, (k, _) = _deconv1x1_operands(h, w)
            conv, s, q = _matmul_stats(a, b)
            cnt = n * k * k
            chan_sum = s.reshape(k * k, cout).sum(0)  # columns are (ky, kx, co)
            chan_ssq = q.reshape(k * k, cout).sum(0)
            conv = conv[0].reshape(n, k, k, cout)     # NHWC
        else:                                         # stride-2 sub-pixel classes
            hh, ww = h.shape[1], h.shape[2]
            a, b = _deconv_s2_operands(h, w)
            conv_cls, chan_sum, chan_ssq = _matmul_stats(a, b)
            cnt = 4 * n * hh * ww
            conv = _interleave_classes_nhwc(conv_cls, n, hh, ww, cout)

        # Training-mode BatchNorm (batch statistics from the f32 accumulator) + ReLU.
        mean = chan_sum / cnt
        var = jnp.maximum(chan_ssq / cnt - mean * mean, 0.0)   # biased var (BatchNorm2d fwd)
        scale = layer["gamma"] * jax.lax.rsqrt(var + BN_EPS)
        shift = layer["beta"] - mean * scale
        hf = jnp.maximum(conv.astype(jnp.float32) * scale + shift, 0.0)
        h = hf.astype(jnp.bfloat16)                            # bf16 activations between layers

    return jnp.transpose(h, (0, 3, 1, 2)).astype(jnp.float32)  # (unreached for DCGAN stack)


# ---------------------------------------------------------------------------
# Pure-JAX f32 reference (for correctness checking only)
# ---------------------------------------------------------------------------

def _ref_conv_transpose_nchw(x, w, stride, pad):
    k = w.shape[-1]
    w_conv = jnp.transpose(jnp.flip(w, (2, 3)), (1, 0, 2, 3))   # (Cout, Cin, K, K)
    return jax.lax.conv_general_dilated(
        x, w_conv, window_strides=(1, 1),
        padding=[(k - 1 - pad, k - 1 - pad)] * 2,
        lhs_dilation=(stride, stride),
        dimension_numbers=("NCHW", "OIHW", "NCHW"),
        precision=jax.lax.Precision.HIGHEST)


def reference_generator_forward(x, params):
    h = x
    for layer in params:
        h = _ref_conv_transpose_nchw(h, layer["w"], layer["stride"], layer["pad"])
        if layer["bn"]:
            mean = jnp.mean(h, axis=(0, 2, 3), keepdims=True)
            var = jnp.var(h, axis=(0, 2, 3), keepdims=True)
            g = layer["gamma"].reshape(1, -1, 1, 1)
            b = layer["beta"].reshape(1, -1, 1, 1)
            h = jnp.maximum((h - mean) * jax.lax.rsqrt(var + BN_EPS) * g + b, 0.0)
        else:
            h = jnp.tanh(h)
    return h


# ---------------------------------------------------------------------------
# Parameter init (DCGAN weights_init: conv ~ N(0, 0.02), BN gamma ~ N(1, 0.02), beta = 0)
# ---------------------------------------------------------------------------

def init_generator_params(key, nz, ngf, nc):
    cfgs = [
        # (cin,     cout,    stride, pad, bn)
        (nz,       ngf * 8, 1, 0, True),
        (ngf * 8,  ngf * 4, 2, 1, True),
        (ngf * 4,  ngf * 2, 2, 1, True),
        (ngf * 2,  ngf,     2, 1, True),
        (ngf,      nc,      2, 1, False),
    ]
    params = []
    for cin, cout, stride, pad, bn in cfgs:
        key, kw, kg = jax.random.split(key, 3)
        layer = {
            "w": 0.02 * jax.random.normal(kw, (cin, cout, 4, 4), jnp.float32),
            "stride": stride,
            "pad": pad,
            "bn": bn,
        }
        if bn:
            layer["gamma"] = 1.0 + 0.02 * jax.random.normal(kg, (cout,), jnp.float32)
            layer["beta"] = jnp.zeros((cout,), jnp.float32)
        params.append(layer)
    return params


if __name__ == "__main__":
    # Small config consistent with the module's forward: x is (batch, nz, 1, 1).
    batch, nz, ngf, nc = 2, 16, 8, 3

    key = jax.random.PRNGKey(0)
    key, kx = jax.random.split(key)
    x = jax.random.normal(kx, (batch, nz, 1, 1), jnp.float32)   # latent noise, NCHW

    params = init_generator_params(key, nz, ngf, nc)

    fwd = jax.jit(functools.partial(generator_forward, params=params))
    y = fwd(x)
    jax.block_until_ready(y)

    assert y.shape == (batch, nc, 64, 64), y.shape
    assert bool(jnp.all(jnp.isfinite(y)))
    assert bool(jnp.all(jnp.abs(y) <= 1.0 + 1e-6))              # tanh output range

    # Loose check against a pure-JAX f32 reference (bf16 matmuls drift at the ~1e-2 level;
    # a decomposition bug would produce O(1) differences).
    y_ref = jax.jit(functools.partial(reference_generator_forward, params=params))(x)
    err = float(jnp.max(jnp.abs(y - y_ref)))
    assert err < 0.25, f"max abs diff vs reference too large: {err}"

    print("KERNEL_OK")
</pallas_src>

<mosaic_0001>
module attributes {stable_mosaic.version = 11 : i64} {
  func.func @_mm_stats_kernel(%arg0: i32, %arg1: i32, %arg2: memref<1x16x128xbf16, #tpu.memory_space<vmem>>, %arg3: memref<1x128x1024xbf16, #tpu.memory_space<vmem>>, %arg4: memref<1x16x1024xbf16, #tpu.memory_space<vmem>>, %arg5: memref<1x1x1x1024xf32, #tpu.memory_space<vmem>>, %arg6: memref<1x1x1x1024xf32, #tpu.memory_space<vmem>>) attributes {dimension_semantics = [#tpu.dimension_semantics<parallel>, #tpu.dimension_semantics<parallel>], iteration_bounds = array<i64: 1, 1>, scalar_prefetch = 0 : i64, scratch_operands = 0 : i64, tpu.core_type = #tpu.core_type<tc>, window_params = [{transform_indices = @transform_0, window_bounds = array<i64: 1, 16, 128>}, {transform_indices = @transform_1, window_bounds = array<i64: 1, 128, 1024>}, {transform_indices = @transform_2, window_bounds = array<i64: 1, 16, 1024>}, {transform_indices = @transform_3, window_bounds = array<i64: 1, 1, 1, 1024>}, {transform_indices = @transform_4, window_bounds = array<i64: 1, 1, 1, 1024>}]} {
    %c0 = arith.constant 0 : index
    %c0_0 = arith.constant 0 : index
    %c0_1 = arith.constant 0 : index
    %0 = vector.load %arg2[%c0, %c0_0, %c0_1] : memref<1x16x128xbf16, #tpu.memory_space<vmem>>, vector<1x16x128xbf16>
    %1 = vector.shape_cast %0 : vector<1x16x128xbf16> to vector<16x128xbf16>
    %c0_2 = arith.constant 0 : index
    %c0_3 = arith.constant 0 : index
    %c0_4 = arith.constant 0 : index
    %2 = vector.load %arg3[%c0_2, %c0_3, %c0_4] : memref<1x128x1024xbf16, #tpu.memory_space<vmem>>, vector<1x128x1024xbf16>
    %3 = vector.shape_cast %2 : vector<1x128x1024xbf16> to vector<128x1024xbf16>
    %cst = arith.constant dense<0.000000e+00> : vector<16x1024xf32>
    %4 = tpu.matmul %1, %3, %cst {dimension_numbers = #tpu.dot_dimension_numbers<[1], [0], [0], [1], [0, 0, 1, 1], [], []>} : vector<16x128xbf16>, vector<128x1024xbf16>, vector<16x1024xf32> -> vector<16x1024xf32>
    %5 = arith.truncf %4 : vector<16x1024xf32> to vector<16x1024xbf16>
    %c0_5 = arith.constant 0 : index
    %c0_6 = arith.constant 0 : index
    %c0_7 = arith.constant 0 : index
    %6 = vector.load %arg4[%c0_5, %c0_6, %c0_7] : memref<1x16x1024xbf16, #tpu.memory_space<vmem>>, vector<1x16x1024xbf16>
    %7 = vector.shape_cast %6 : vector<1x16x1024xbf16> to vector<16x1024xbf16>
    %8 = vector.shape_cast %5 : vector<16x1024xbf16> to vector<1x16x1024xbf16>
    tpu.vector_store %arg4[%c0_5, %c0_6, %c0_7], %8 {strides = array<i32>} : memref<1x16x1024xbf16, #tpu.memory_space<vmem>>, vector<1x16x1024xbf16>,
    %cst_8 = arith.constant dense<0.000000e+00> : vector<1024xf32>
    %9 = vector.multi_reduction <add>, %4, %cst_8 [0] : vector<16x1024xf32> to vector<1024xf32>
    %10 = vector.shape_cast %9 : vector<1024xf32> to vector<1x1024xf32>
    %11 = vector.shape_cast %10 : vector<1x1024xf32> to vector<1x1x1x1024xf32>
    %c0_9 = arith.constant 0 : index
    %c0_10 = arith.constant 0 : index
    %c0_11 = arith.constant 0 : index
    %c0_12 = arith.constant 0 : index
    %12 = vector.load %arg5[%c0_9, %c0_10, %c0_11, %c0_12] : memref<1x1x1x1024xf32, #tpu.memory_space<vmem>>, vector<1x1x1x1024xf32>
    tpu.vector_store %arg5[%c0_9, %c0_10, %c0_11, %c0_12], %11 {strides = array<i32>} : memref<1x1x1x1024xf32, #tpu.memory_space<vmem>>, vector<1x1x1x1024xf32>,
    %13 = arith.mulf %4, %4 : vector<16x1024xf32>
    %cst_13 = arith.constant dense<0.000000e+00> : vector<1024xf32>
    %14 = vector.multi_reduction <add>, %13, %cst_13 [0] : vector<16x1024xf32> to vector<1024xf32>
    %15 = vector.shape_cast %14 : vector<1024xf32> to vector<1x1024xf32>
    %16 = vector.shape_cast %15 : vector<1x1024xf32> to vector<1x1x1x1024xf32>
    %c0_14 = arith.constant 0 : index
    %c0_15 = arith.constant 0 : index
    %c0_16 = arith.constant 0 : index
    %c0_17 = arith.constant 0 : index
    %17 = vector.load %arg6[%c0_14, %c0_15, %c0_16, %c0_17] : memref<1x1x1x1024xf32, #tpu.memory_space<vmem>>, vector<1x1x1x1024xf32>
    tpu.vector_store %arg6[%c0_14, %c0_15, %c0_16, %c0_17], %16 {strides = array<i32>} : memref<1x1x1x1024xf32, #tpu.memory_space<vmem>>, vector<1x1x1x1024xf32>,
    return
  }
  func.func @transform_0(%arg0: i32, %arg1: i32) -> (i32, i32, i32) {
    %c0_i32 = arith.constant 0 : i32
    %c0_i32_0 = arith.constant 0 : i32
    return %arg0, %arg1, %c0_i32 : i32, i32, i32
  }
  func.func @transform_1(%arg0: i32, %arg1: i32) -> (i32, i32, i32) {
    %c0_i32 = arith.constant 0 : i32
    %c0_i32_0 = arith.constant 0 : i32
    %c0_i32_1 = arith.constant 0 : i32
    return %arg0, %c0_i32, %c0_i32_0 : i32, i32, i32
  }
  func.func @transform_2(%arg0: i32, %arg1: i32) -> (i32, i32, i32) {
    %c0_i32 = arith.constant 0 : i32
    %c0_i32_0 = arith.constant 0 : i32
    return %arg0, %arg1, %c0_i32 : i32, i32, i32
  }
  func.func @transform_3(%arg0: i32, %arg1: i32) -> (i32, i32, i32, i32) {
    %c0_i32 = arith.constant 0 : i32
    %c0_i32_0 = arith.constant 0 : i32
    %c0_i32_1 = arith.constant 0 : i32
    return %arg0, %arg1, %c0_i32, %c0_i32_0 : i32, i32, i32, i32
  }
  func.func @transform_4(%arg0: i32, %arg1: i32) -> (i32, i32, i32, i32) {
    %c0_i32 = arith.constant 0 : i32
    %c0_i32_0 = arith.constant 0 : i32
    %c0_i32_1 = arith.constant 0 : i32
    return %arg0, %arg1, %c0_i32, %c0_i32_0 : i32, i32, i32, i32
  }
}

module attributes {stable_mosaic.version = 11 : i64} {
  func.func @_mm_stats_kernel(%arg0: i32, %arg1: i32, %arg2: memref<1x32x256xbf16, #tpu.memory_space<vmem>>, %arg3: memref<1x256x128xbf16, #tpu.memory_space<vmem>>, %arg4: memref<1x32x128xbf16, #tpu.memory_space<vmem>>, %arg5: memref<1x1x1x128xf32, #tpu.memory_space<vmem>>, %arg6: memref<1x1x1x128xf32, #tpu.memory_space<vmem>>) attributes {dimension_semantics = [#tpu.dimension_semantics<parallel>, #tpu.dimension_semantics<parallel>], iteration_bounds = array<i64: 4, 1>, scalar_prefetch = 0 : i64, scratch_operands = 0 : i64, tpu.core_type = #tpu.core_type<tc>, window_params = [{transform_indices = @transform_0, window_bounds = array<i64: 1, 32, 256>}, {transform_indices = @transform_1, window_bounds = array<i64: 1, 256, 128>}, {transform_indices = @transform_2, window_bounds = array<i64: 1, 32, 128>}, {transform_indices = @transform_3, window_bounds = array<i64: 1, 1, 1, 128>}, {transform_indices = @transform_4, window_bounds = array<i64: 1, 1, 1, 128>}]} {
    %c0 = arith.constant 0 : index
    %c0_0 = arith.constant 0 : index
    %c0_1 = arith.constant 0 : index
    %0 = vector.load %arg2[%c0, %c0_0, %c0_1] : memref<1x32x256xbf16, #tpu.memory_space<vmem>>, vector<1x32x256xbf16>
    %1 = vector.shape_cast %0 : vector<1x32x256xbf16> to vector<32x256xbf16>
    %c0_2 = arith.constant 0 : index
    %c0_3 = arith.constant 0 : index
    %c0_4 = arith.constant 0 : index
    %2 = vector.load %arg3[%c0_2, %c0_3, %c0_4] : memref<1x256x128xbf16, #tpu.memory_space<vmem>>, vector<1x256x128xbf16>
    %3 = vector.shape_cast %2 : vector<1x256x128xbf16> to vector<256x128xbf16>
    %cst = arith.constant dense<0.000000e+00> : vector<32x128xf32>
    %4 = tpu.matmul %1, %3, %cst {dimension_numbers = #tpu.dot_dimension_numbers<[1], [0], [0], [1], [0, 0, 1, 1], [], []>} : vector<32x256xbf16>, vector<256x128xbf16>, vector<32x128xf32> -> vector<32x128xf32>
    %5 = arith.truncf %4 : vector<32x128xf32> to vector<32x128xbf16>
    %c0_5 = arith.constant 0 : index
    %c0_6 = arith.constant 0 : index
    %c0_7 = arith.constant 0 : index
    %6 = vector.load %arg4[%c0_5, %c0_6, %c0_7] : memref<1x32x128xbf16, #tpu.memory_space<vmem>>, vector<1x32x128xbf16>
    %7 = vector.shape_cast %6 : vector<1x32x128xbf16> to vector<32x128xbf16>
    %8 = vector.shape_cast %5 : vector<32x128xbf16> to vector<1x32x128xbf16>
    tpu.vector_store %arg4[%c0_5, %c0_6, %c0_7], %8 {strides = array<i32>} : memref<1x32x128xbf16, #tpu.memory_space<vmem>>, vector<1x32x128xbf16>,
    %cst_8 = arith.constant dense<0.000000e+00> : vector<128xf32>
    %9 = vector.multi_reduction <add>, %4, %cst_8 [0] : vector<32x128xf32> to vector<128xf32>
    %10 = vector.shape_cast %9 : vector<128xf32> to vector<1x128xf32>
    %11 = vector.shape_cast %10 : vector<1x128xf32> to vector<1x1x1x128xf32>
    %c0_9 = arith.constant 0 : index
    %c0_10 = arith.constant 0 : index
    %c0_11 = arith.constant 0 : index
    %c0_12 = arith.constant 0 : index
    %12 = vector.load %arg5[%c0_9, %c0_10, %c0_11, %c0_12] : memref<1x1x1x128xf32, #tpu.memory_space<vmem>>, vector<1x1x1x128xf32>
    tpu.vector_store %arg5[%c0_9, %c0_10, %c0_11, %c0_12], %11 {strides = array<i32>} : memref<1x1x1x128xf32, #tpu.memory_space<vmem>>, vector<1x1x1x128xf32>,
    %13 = arith.mulf %4, %4 : vector<32x128xf32>
    %cst_13 = arith.constant dense<0.000000e+00> : vector<128xf32>
    %14 = vector.multi_reduction <add>, %13, %cst_13 [0] : vector<32x128xf32> to vector<128xf32>
    %15 = vector.shape_cast %14 : vector<128xf32> to vector<1x128xf32>
    %16 = vector.shape_cast %15 : vector<1x128xf32> to vector<1x1x1x128xf32>
    %c0_14 = arith.constant 0 : index
    %c0_15 = arith.constant 0 : index
    %c0_16 = arith.constant 0 : index
    %c0_17 = arith.constant 0 : index
    %17 = vector.load %arg6[%c0_14, %c0_15, %c0_16, %c0_17] : memref<1x1x1x128xf32, #tpu.memory_space<vmem>>, vector<1x1x1x128xf32>
    tpu.vector_store %arg6[%c0_14, %c0_15, %c0_16, %c0_17], %16 {strides = array<i32>} : memref<1x1x1x128xf32, #tpu.memory_space<vmem>>, vector<1x1x1x128xf32>,
    return
  }
  func.func @transform_0(%arg0: i32, %arg1: i32) -> (i32, i32, i32) {
    %c0_i32 = arith.constant 0 : i32
    %c0_i32_0 = arith.constant 0 : i32
    return %arg0, %arg1, %c0_i32 : i32, i32, i32
  }
  func.func @transform_1(%arg0: i32, %arg1: i32) -> (i32, i32, i32) {
    %c0_i32 = arith.constant 0 : i32
    %c0_i32_0 = arith.constant 0 : i32
    %c0_i32_1 = arith.constant 0 : i32
    return %arg0, %c0_i32, %c0_i32_0 : i32, i32, i32
  }
  func.func @transform_2(%arg0: i32, %arg1: i32) -> (i32, i32, i32) {
    %c0_i32 = arith.constant 0 : i32
    %c0_i32_0 = arith.constant 0 : i32
    return %arg0, %arg1, %c0_i32 : i32, i32, i32
  }
  func.func @transform_3(%arg0: i32, %arg1: i32) -> (i32, i32, i32, i32) {
    %c0_i32 = arith.constant 0 : i32
    %c0_i32_0 = arith.constant 0 : i32
    %c0_i32_1 = arith.constant 0 : i32
    return %arg0, %arg1, %c0_i32, %c0_i32_0 : i32, i32, i32, i32
  }
  func.func @transform_4(%arg0: i32, %arg1: i32) -> (i32, i32, i32, i32) {
    %c0_i32 = arith.constant 0 : i32
    %c0_i32_0 = arith.constant 0 : i32
    %c0_i32_1 = arith.constant 0 : i32
    return %arg0, %arg1, %c0_i32, %c0_i32_0 : i32, i32, i32, i32
  }
}

module attributes {stable_mosaic.version = 11 : i64} {
  func.func @_mm_stats_kernel(%arg0: i32, %arg1: i32, %arg2: memref<1x128x128xbf16, #tpu.memory_space<vmem>>, %arg3: memref<1x128x128xbf16, #tpu.memory_space<vmem>>, %arg4: memref<1x128x128xbf16, #tpu.memory_space<vmem>>, %arg5: memref<1x1x1x128xf32, #tpu.memory_space<vmem>>, %arg6: memref<1x1x1x128xf32, #tpu.memory_space<vmem>>) attributes {dimension_semantics = [#tpu.dimension_semantics<parallel>, #tpu.dimension_semantics<parallel>], iteration_bounds = array<i64: 4, 1>, scalar_prefetch = 0 : i64, scratch_operands = 0 : i64, tpu.core_type = #tpu.core_type<tc>, window_params = [{transform_indices = @transform_0, window_bounds = array<i64: 1, 128, 128>}, {transform_indices = @transform_1, window_bounds = array<i64: 1, 128, 128>}, {transform_indices = @transform_2, window_bounds = array<i64: 1, 128, 128>}, {transform_indices = @transform_3, window_bounds = array<i64: 1, 1, 1, 128>}, {transform_indices = @transform_4, window_bounds = array<i64: 1, 1, 1, 128>}]} {
    %c0 = arith.constant 0 : index
    %c0_0 = arith.constant 0 : index
    %c0_1 = arith.constant 0 : index
    %0 = vector.load %arg2[%c0, %c0_0, %c0_1] : memref<1x128x128xbf16, #tpu.memory_space<vmem>>, vector<1x128x128xbf16>
    %1 = vector.shape_cast %0 : vector<1x128x128xbf16> to vector<128x128xbf16>
    %c0_2 = arith.constant 0 : index
    %c0_3 = arith.constant 0 : index
    %c0_4 = arith.constant 0 : index
    %2 = vector.load %arg3[%c0_2, %c0_3, %c0_4] : memref<1x128x128xbf16, #tpu.memory_space<vmem>>, vector<1x128x128xbf16>
    %3 = vector.shape_cast %2 : vector<1x128x128xbf16> to vector<128x128xbf16>
    %cst = arith.constant dense<0.000000e+00> : vector<128x128xf32>
    %4 = tpu.matmul %1, %3, %cst {dimension_numbers = #tpu.dot_dimension_numbers<[1], [0], [0], [1], [0, 0, 1, 1], [], []>} : vector<128x128xbf16>, vector<128x128xbf16>, vector<128x128xf32> -> vector<128x128xf32>
    %5 = arith.truncf %4 : vector<128x128xf32> to vector<128x128xbf16>
    %c0_5 = arith.constant 0 : index
    %c0_6 = arith.constant 0 : index
    %c0_7 = arith.constant 0 : index
    %6 = vector.load %arg4[%c0_5, %c0_6, %c0_7] : memref<1x128x128xbf16, #tpu.memory_space<vmem>>, vector<1x128x128xbf16>
    %7 = vector.shape_cast %6 : vector<1x128x128xbf16> to vector<128x128xbf16>
    %8 = vector.shape_cast %5 : vector<128x128xbf16> to vector<1x128x128xbf16>
    tpu.vector_store %arg4[%c0_5, %c0_6, %c0_7], %8 {strides = array<i32>} : memref<1x128x128xbf16, #tpu.memory_space<vmem>>, vector<1x128x128xbf16>,
    %cst_8 = arith.constant dense<0.000000e+00> : vector<128xf32>
    %9 = vector.multi_reduction <add>, %4, %cst_8 [0] : vector<128x128xf32> to vector<128xf32>
    %10 = vector.shape_cast %9 : vector<128xf32> to vector<1x128xf32>
    %11 = vector.shape_cast %10 : vector<1x128xf32> to vector<1x1x1x128xf32>
    %c0_9 = arith.constant 0 : index
    %c0_10 = arith.constant 0 : index
    %c0_11 = arith.constant 0 : index
    %c0_12 = arith.constant 0 : index
    %12 = vector.load %arg5[%c0_9, %c0_10, %c0_11, %c0_12] : memref<1x1x1x128xf32, #tpu.memory_space<vmem>>, vector<1x1x1x128xf32>
    tpu.vector_store %arg5[%c0_9, %c0_10, %c0_11, %c0_12], %11 {strides = array<i32>} : memref<1x1x1x128xf32, #tpu.memory_space<vmem>>, vector<1x1x1x128xf32>,
    %13 = arith.mulf %4, %4 : vector<128x128xf32>
    %cst_13 = arith.constant dense<0.000000e+00> : vector<128xf32>
    %14 = vector.multi_reduction <add>, %13, %cst_13 [0] : vector<128x128xf32> to vector<128xf32>
    %15 = vector.shape_cast %14 : vector<128xf32> to vector<1x128xf32>
    %16 = vector.shape_cast %15 : vector<1x128xf32> to vector<1x1x1x128xf32>
    %c0_14 = arith.constant 0 : index
    %c0_15 = arith.constant 0 : index
    %c0_16 = arith.constant 0 : index
    %c0_17 = arith.constant 0 : index
    %17 = vector.load %arg6[%c0_14, %c0_15, %c0_16, %c0_17] : memref<1x1x1x128xf32, #tpu.memory_space<vmem>>, vector<1x1x1x128xf32>
    tpu.vector_store %arg6[%c0_14, %c0_15, %c0_16, %c0_17], %16 {strides = array<i32>} : memref<1x1x1x128xf32, #tpu.memory_space<vmem>>, vector<1x1x1x128xf32>,
    return
  }
  func.func @transform_0(%arg0: i32, %arg1: i32) -> (i32, i32, i32) {
    %c0_i32 = arith.constant 0 : i32
    %c0_i32_0 = arith.constant 0 : i32
    return %arg0, %arg1, %c0_i32 : i32, i32, i32
  }
  func.func @transform_1(%arg0: i32, %arg1: i32) -> (i32, i32, i32) {
    %c0_i32 = arith.constant 0 : i32
    %c0_i32_0 = arith.constant 0 : i32
    %c0_i32_1 = arith.constant 0 : i32
    return %arg0, %c0_i32, %c0_i32_0 : i32, i32, i32
  }
  func.func @transform_2(%arg0: i32, %arg1: i32) -> (i32, i32, i32) {
    %c0_i32 = arith.constant 0 : i32
    %c0_i32_0 = arith.constant 0 : i32
    return %arg0, %arg1, %c0_i32 : i32, i32, i32
  }
  func.func @transform_3(%arg0: i32, %arg1: i32) -> (i32, i32, i32, i32) {
    %c0_i32 = arith.constant 0 : i32
    %c0_i32_0 = arith.constant 0 : i32
    %c0_i32_1 = arith.constant 0 : i32
    return %arg0, %arg1, %c0_i32, %c0_i32_0 : i32, i32, i32, i32
  }
  func.func @transform_4(%arg0: i32, %arg1: i32) -> (i32, i32, i32, i32) {
    %c0_i32 = arith.constant 0 : i32
    %c0_i32_0 = arith.constant 0 : i32
    %c0_i32_1 = arith.constant 0 : i32
    return %arg0, %arg1, %c0_i32, %c0_i32_0 : i32, i32, i32, i32
  }
}

module attributes {stable_mosaic.version = 11 : i64} {
  func.func @_mm_stats_kernel(%arg0: i32, %arg1: i32, %arg2: memref<1x512x128xbf16, #tpu.memory_space<vmem>>, %arg3: memref<1x128x128xbf16, #tpu.memory_space<vmem>>, %arg4: memref<1x512x128xbf16, #tpu.memory_space<vmem>>, %arg5: memref<1x1x1x128xf32, #tpu.memory_space<vmem>>, %arg6: memref<1x1x1x128xf32, #tpu.memory_space<vmem>>) attributes {dimension_semantics = [#tpu.dimension_semantics<parallel>, #tpu.dimension_semantics<parallel>], iteration_bounds = array<i64: 4, 1>, scalar_prefetch = 0 : i64, scratch_operands = 0 : i64, tpu.core_type = #tpu.core_type<tc>, window_params = [{transform_indices = @transform_0, window_bounds = array<i64: 1, 512, 128>}, {transform_indices = @transform_1, window_bounds = array<i64: 1, 128, 128>}, {transform_indices = @transform_2, window_bounds = array<i64: 1, 512, 128>}, {transform_indices = @transform_3, window_bounds = array<i64: 1, 1, 1, 128>}, {transform_indices = @transform_4, window_bounds = array<i64: 1, 1, 1, 128>}]} {
    %c0 = arith.constant 0 : index
    %c0_0 = arith.constant 0 : index
    %c0_1 = arith.constant 0 : index
    %0 = vector.load %arg2[%c0, %c0_0, %c0_1] : memref<1x512x128xbf16, #tpu.memory_space<vmem>>, vector<1x512x128xbf16>
    %1 = vector.shape_cast %0 : vector<1x512x128xbf16> to vector<512x128xbf16>
    %c0_2 = arith.constant 0 : index
    %c0_3 = arith.constant 0 : index
    %c0_4 = arith.constant 0 : index
    %2 = vector.load %arg3[%c0_2, %c0_3, %c0_4] : memref<1x128x128xbf16, #tpu.memory_space<vmem>>, vector<1x128x128xbf16>
    %3 = vector.shape_cast %2 : vector<1x128x128xbf16> to vector<128x128xbf16>
    %cst = arith.constant dense<0.000000e+00> : vector<512x128xf32>
    %4 = tpu.matmul %1, %3, %cst {dimension_numbers = #tpu.dot_dimension_numbers<[1], [0], [0], [1], [0, 0, 1, 1], [], []>} : vector<512x128xbf16>, vector<128x128xbf16>, vector<512x128xf32> -> vector<512x128xf32>
    %5 = arith.truncf %4 : vector<512x128xf32> to vector<512x128xbf16>
    %c0_5 = arith.constant 0 : index
    %c0_6 = arith.constant 0 : index
    %c0_7 = arith.constant 0 : index
    %6 = vector.load %arg4[%c0_5, %c0_6, %c0_7] : memref<1x512x128xbf16, #tpu.memory_space<vmem>>, vector<1x512x128xbf16>
    %7 = vector.shape_cast %6 : vector<1x512x128xbf16> to vector<512x128xbf16>
    %8 = vector.shape_cast %5 : vector<512x128xbf16> to vector<1x512x128xbf16>
    tpu.vector_store %arg4[%c0_5, %c0_6, %c0_7], %8 {strides = array<i32>} : memref<1x512x128xbf16, #tpu.memory_space<vmem>>, vector<1x512x128xbf16>,
    %cst_8 = arith.constant dense<0.000000e+00> : vector<128xf32>
    %9 = vector.multi_reduction <add>, %4, %cst_8 [0] : vector<512x128xf32> to vector<128xf32>
    %10 = vector.shape_cast %9 : vector<128xf32> to vector<1x128xf32>
    %11 = vector.shape_cast %10 : vector<1x128xf32> to vector<1x1x1x128xf32>
    %c0_9 = arith.constant 0 : index
    %c0_10 = arith.constant 0 : index
    %c0_11 = arith.constant 0 : index
    %c0_12 = arith.constant 0 : index
    %12 = vector.load %arg5[%c0_9, %c0_10, %c0_11, %c0_12] : memref<1x1x1x128xf32, #tpu.memory_space<vmem>>, vector<1x1x1x128xf32>
    tpu.vector_store %arg5[%c0_9, %c0_10, %c0_11, %c0_12], %11 {strides = array<i32>} : memref<1x1x1x128xf32, #tpu.memory_space<vmem>>, vector<1x1x1x128xf32>,
    %13 = arith.mulf %4, %4 : vector<512x128xf32>
    %cst_13 = arith.constant dense<0.000000e+00> : vector<128xf32>
    %14 = vector.multi_reduction <add>, %13, %cst_13 [0] : vector<512x128xf32> to vector<128xf32>
    %15 = vector.shape_cast %14 : vector<128xf32> to vector<1x128xf32>
    %16 = vector.shape_cast %15 : vector<1x128xf32> to vector<1x1x1x128xf32>
    %c0_14 = arith.constant 0 : index
    %c0_15 = arith.constant 0 : index
    %c0_16 = arith.constant 0 : index
    %c0_17 = arith.constant 0 : index
    %17 = vector.load %arg6[%c0_14, %c0_15, %c0_16, %c0_17] : memref<1x1x1x128xf32, #tpu.memory_space<vmem>>, vector<1x1x1x128xf32>
    tpu.vector_store %arg6[%c0_14, %c0_15, %c0_16, %c0_17], %16 {strides = array<i32>} : memref<1x1x1x128xf32, #tpu.memory_space<vmem>>, vector<1x1x1x128xf32>,
    return
  }
  func.func @transform_0(%arg0: i32, %arg1: i32) -> (i32, i32, i32) {
    %c0_i32 = arith.constant 0 : i32
    %c0_i32_0 = arith.constant 0 : i32
    return %arg0, %arg1, %c0_i32 : i32, i32, i32
  }
  func.func @transform_1(%arg0: i32, %arg1: i32) -> (i32, i32, i32) {
    %c0_i32 = arith.constant 0 : i32
    %c0_i32_0 = arith.constant 0 : i32
    %c0_i32_1 = arith.constant 0 : i32
    return %arg0, %c0_i32, %c0_i32_0 : i32, i32, i32
  }
  func.func @transform_2(%arg0: i32, %arg1: i32) -> (i32, i32, i32) {
    %c0_i32 = arith.constant 0 : i32
    %c0_i32_0 = arith.constant 0 : i32
    return %arg0, %arg1, %c0_i32 : i32, i32, i32
  }
  func.func @transform_3(%arg0: i32, %arg1: i32) -> (i32, i32, i32, i32) {
    %c0_i32 = arith.constant 0 : i32
    %c0_i32_0 = arith.constant 0 : i32
    %c0_i32_1 = arith.constant 0 : i32
    return %arg0, %arg1, %c0_i32, %c0_i32_0 : i32, i32, i32, i32
  }
  func.func @transform_4(%arg0: i32, %arg1: i32) -> (i32, i32, i32, i32) {
    %c0_i32 = arith.constant 0 : i32
    %c0_i32_0 = arith.constant 0 : i32
    %c0_i32_1 = arith.constant 0 : i32
    return %arg0, %arg1, %c0_i32, %c0_i32_0 : i32, i32, i32, i32
  }
}

module attributes {stable_mosaic.version = 11 : i64} {
  func.func @_mm_tanh_t_kernel(%arg0: i32, %arg1: i32, %arg2: memref<1x16x128xbf16, #tpu.memory_space<vmem>>, %arg3: memref<1x512x128xbf16, #tpu.memory_space<vmem>>, %arg4: memref<1x16x512xbf16, #tpu.memory_space<vmem>>) attributes {dimension_semantics = [#tpu.dimension_semantics<parallel>, #tpu.dimension_semantics<parallel>], iteration_bounds = array<i64: 4, 4>, scalar_prefetch = 0 : i64, scratch_operands = 0 : i64, tpu.core_type = #tpu.core_type<tc>, window_params = [{transform_indices = @transform_0, window_bounds = array<i64: 1, 16, 128>}, {transform_indices = @transform_1, window_bounds = array<i64: 1, 512, 128>}, {transform_indices = @transform_2, window_bounds = array<i64: 1, 16, 512>}]} {
    %c0 = arith.constant 0 : index
    %c0_0 = arith.constant 0 : index
    %c0_1 = arith.constant 0 : index
    %0 = vector.load %arg2[%c0, %c0_0, %c0_1] : memref<1x16x128xbf16, #tpu.memory_space<vmem>>, vector<1x16x128xbf16>
    %1 = vector.shape_cast %0 : vector<1x16x128xbf16> to vector<16x128xbf16>
    %c0_2 = arith.constant 0 : index
    %c0_3 = arith.constant 0 : index
    %c0_4 = arith.constant 0 : index
    %2 = vector.load %arg3[%c0_2, %c0_3, %c0_4] : memref<1x512x128xbf16, #tpu.memory_space<vmem>>, vector<1x512x128xbf16>
    %3 = vector.shape_cast %2 : vector<1x512x128xbf16> to vector<512x128xbf16>
    %cst = arith.constant dense<0.000000e+00> : vector<16x512xf32>
    %4 = tpu.matmul %1, %3, %cst {dimension_numbers = #tpu.dot_dimension_numbers<[1], [1], [0], [0], [0, 0, 1, 0], [], []>} : vector<16x128xbf16>, vector<512x128xbf16>, vector<16x512xf32> -> vector<16x512xf32>
    %5 = math.tanh %4 : vector<16x512xf32>
    %6 = arith.truncf %5 : vector<16x512xf32> to vector<16x512xbf16>
    %c0_5 = arith.constant 0 : index
    %c0_6 = arith.constant 0 : index
    %c0_7 = arith.constant 0 : index
    %7 = vector.load %arg4[%c0_5, %c0_6, %c0_7] : memref<1x16x512xbf16, #tpu.memory_space<vmem>>, vector<1x16x512xbf16>
    %8 = vector.shape_cast %7 : vector<1x16x512xbf16> to vector<16x512xbf16>
    %9 = vector.shape_cast %6 : vector<16x512xbf16> to vector<1x16x512xbf16>
    tpu.vector_store %arg4[%c0_5, %c0_6, %c0_7], %9 {strides = array<i32>} : memref<1x16x512xbf16, #tpu.memory_space<vmem>>, vector<1x16x512xbf16>,
    return
  }
  func.func @transform_0(%arg0: i32, %arg1: i32) -> (i32, i32, i32) {
    %c0_i32 = arith.constant 0 : i32
    %c0_i32_0 = arith.constant 0 : i32
    %c0_i32_1 = arith.constant 0 : i32
    return %arg0, %c0_i32, %c0_i32_0 : i32, i32, i32
  }
  func.func @transform_1(%arg0: i32, %arg1: i32) -> (i32, i32, i32) {
    %c0_i32 = arith.constant 0 : i32
    %c0_i32_0 = arith.constant 0 : i32
    return %arg0, %arg1, %c0_i32 : i32, i32, i32
  }
  func.func @transform_2(%arg0: i32, %arg1: i32) -> (i32, i32, i32) {
    %c0_i32 = arith.constant 0 : i32
    %c0_i32_0 = arith.constant 0 : i32
    return %arg0, %c0_i32, %arg1 : i32, i32, i32
  }
}

</mosaic_0001>

<bundles_post_ra>
// kernel: generator_forward.6
= control target key start
LH: loop header
LB: loop body
LE: loop exit
PB: predicated region body
PF: predicated region fallthrough
CT: control target
= control target key end

     0   :  { %10 = vsyncpa [#allocation3], 0  ;;  %s1189_s0 = inlined_call_operand.vmem [shape: bf16[4,32,256], index: 0, kind: input, shape index: {}]   ;;  %s1190_s1 = inlined_call_operand.hbm [shape: bf16[4,256,128], index: 1, kind: input, shape index: {}]   ;;  %s1191_s2 = inlined_call_operand.vmem [shape: bf16[4,32,128], index: 2, kind: output, shape index: {0}]   ;;  %s1192_s3 = inlined_call_operand.vmem [shape: f32[4,1,1,128], index: 3, kind: output, shape index: {1}]   ;;  %s1193_s4 = inlined_call_operand.vmem [shape: f32[4,1,1,128], index: 4, kind: output, shape index: {2}]  }
   0x1   :  { %12 = vsyncpa [#allocation3 + $0x1], 0  ;;  %s1032_s15 = smov 0   ;;  %s1034_s16 = smov 0  }
   0x2   :  { %s1036_s17 = smov 0   ;;  %s1038_s18 = smov 0  }
   0x3   :  { %s1040_s19 = smov 0   ;;  %s1042_s20 = smov 0  }
   0x4 LB: > { %s742_s21 = sadd.s32 4294967295, %s1002_s20   ;;  %s30_s22 = sadd.s32 1, %s998_s19  ;;  %s1002_s20 = sphi %s1042_s20, %s18_s20   ;;  %s998_s19 = sphi %s1040_s19, %s1201_s19   ;;  %s994_s18 = sphi %s1038_s18, %s1200_s18   ;;  %s990_s17 = sphi %s1036_s17, %s1199_s17   ;;  %s986_s16 = sphi %s1034_s16, %s1198_s16   ;;  %s982_s15 = sphi %s1032_s15, %s1197_s15  }
   0x5   : > { %p32_p0 = scmp.ge.s32.totalorder %s30_s22, 4  ;;  %s65_s23 = sadd.s32 1, %s990_s17 }
   0x6   : > { %p72_p1 = scmp.ne.s32.totalorder %s990_s17, %s986_s16  ;;  %p73_p2 = scmp.eq.s32.totalorder %s1002_s20, 0 }
   0x7   : > { %s1203_s22 = smov (%p32_p0, %s30_s22), 0  ;;  %p78_p4 = scmp.ne.s32.totalorder %s986_s16, %s982_s15 }
   0x8   : > { %p1068_p3 = por %p73_p2, %p72_p1  ;;  %s62_s25 = ssub.s32 %s998_s19, %s1203_s22 }
   0x9   : > { %p79_p5 = scmp.eq.s32.totalorder %s742_s21, 0  ;;  %p63_p6 = scmp.eq.s32.totalorder %s62_s25, 0 }
   0xa   : > { %p849_p8 = scmp.lt.s32.totalorder %s1002_s20, 4  ;;  %s200_s28 = sand.u32 1, %s990_s17  }
   0xb   : > { %p1075_p7 = por %p79_p5, %p78_p4  ;;  %s781_s29 = sshll.u32 %s998_s19, 11 }
   0xc   : > { %s1081_s27 = scalar_select %p63_p6, %s990_s17, %s65_s23  }
   0xd   : > { %s746_s30 = sshll.u32 %s200_s28, 7  ;;  %s1088_s7 = scalar_lea.hbm %s1190_s1, %s781_s29 }
   0xe   : > { %s204_s8 = scalar_lea.vmem [#allocation2], %s746_s30  ;;  %p1092_p9 = pnand %p849_p8, %p1068_p3 }
   0xf   : > { %s211_s9 = sshll.u32 %s204_s8, 4  ;;  %s1098_s11 = scalar_lea.sflag [#allocation3], %s200_s28  ;;  %s1096_s9 = int_to_ptr.vmem [resolvable:$true] %s211_s9 }
  0x10   : > { %s922_s12 = scalar_lea.hbm %s1088_s7, 2048  ;;  %p924_p11 = pneg %p1092_p9 }
  0x11   : > { %p923_p10 = scmp.ne.s32.totalorder %s1088_s7, %s922_s12  ;;  %s927_s15 = scalar_lea.hbm %s1190_s1, 8192 }
  0x12   : > { %p928_p0 = scmp.lt.u32.totalorder %s1088_s7, %s1190_s1  ;;  %p929_p1 = scmp.lt.u32.totalorder %s927_s15, %s922_s12 }
  0x13   : > { %p925_p12 = pnand %p924_p11, %p923_p10  ;;  %p931_p3 = scmp.lt.u32.totalorder %s922_s12, %s1088_s7 }
  0x14   : > { %p930_p2 = por %p929_p1, %p928_p0 }
  0x15   : > { %p926_p13 = pneg %p925_p12 }
  0x16   : > { %p932_p4 = por %p931_p3, %p930_p2 }
  0x18   : > { %p933_p5 = pnand %p932_p4, %p926_p13 }
  0x1a   : > { %936 = shalt.err (!%p933_p5)
}
  0x1b   : > { %s937_s24 = scalar_lea.vmem %s1096_s9, 2048  ;;  %s1004_s25 = smov [#allocation2]  }
  0x1c   : > { %p938_p6 = scmp.ne.s32.totalorder %s1096_s9, %s937_s24  ;;  %s942_s28 = sshll.u32 %s1004_s25, 4  ;;  %s943_s28 = int_to_ptr.vmem [resolvable:$false] %s942_s28 }
  0x1d   : > { %s944_s29 = scalar_lea.vmem %s943_s28, 4096  ;;  %p945_p12 = scmp.lt.s32.totalorder %s1096_s9, %s943_s28 }
  0x1e   : > { %p940_p8 = pnand %p938_p6, %p924_p11  ;;  %p946_p0 = scmp.lt.s32.totalorder %s944_s29, %s937_s24 }
  0x20   : > { %p941_p10 = pneg %p940_p8  ;;  %p947_p1 = por %p946_p0, %p945_p12 }
  0x22   : > { %p948_p2 = pnand %p947_p1, %p941_p10 }
  0x24   : > { %951 = shalt.err (!%p948_p2)
}
  0x25   : > { %s1005_s30 = smov 64   ;;  %s1006_s5 = smov 4  }
  0x26   : > { %848 = dma.hbm_to_vmem [thread:$0]  (!%p1092_p9), %s1088_s7, 2048, %s1096_s9, %s1098_s11, %s1005_s30, %s1005_s30, %s1006_s5  }
  0x27   : > { %p749_p11 = scmp.ge.s32.totalorder %s1002_s20, 1  ;;  %p219_p13 = scmp.lt.s32.totalorder %s1002_s20, 5 }
  0x29   : > { %p220_p3 = pnand %p749_p11, %p219_p13 }
  0x2a   : > { %s225_s6 = sand.u32 (!%p220_p3), 1, %s986_s16  }
  0x2b   : > { %223 = sbr.rel (%p220_p3) target bundleno = 322 (0x142), region = 28  ;;  %s750_s8 = sshll.u32 (!%p220_p3), %s225_s6, 7 }
  0x2c   : > { %s226_s12 = scalar_lea.sflag (!%p220_p3), [#allocation3], %s225_s6  ;;  %s1129_s13 = scalar_lea.vmem (!%p220_p3), [#allocation2], %s750_s8 }
  0x32   : > { %977 = dma.done.wait (%p1075_p7), %s226_s12, 2048  }
  0x33   : > { %979 = vsyncadd (%p1075_p7), %s226_s12, 4294965248  ;;  %v900_v0 = vld [vmem:[%s1129_s13 + $0x40] sm:$0xff]   ;;  %v902_v2 = vld [vmem:[%s1129_s13 + $0x48] sm:$0xff]   ;;  %p281_p9 = scmp.lt.s32.totalorder %s994_s18, 3 }
  0x34   : > { %v901_v1 = vld [vmem:[%s1129_s13] sm:$0xff]   ;;  %799 = vmatprep.subr.bf16.mxu0 %v900_v0  ;;  %827 = vmatprep.subr.bf16.mxu1 %v900_v0  ;;  %v903_v3 = vld [vmem:[%s1129_s13 + $0x8] sm:$0xff]   ;;  %v904_v4 = vld [vmem:[%s1129_s13 + $0x50] sm:$0xff]  }
  0x35   : > { %800 = vmatpush3.bf16.msra.mxu0 %v901_v1  ;;  %835 = vmatpush3.bf16.msra.mxu1 %v901_v1  ;;  %v905_v5 = vld [vmem:[%s1129_s13 + $0x10] sm:$0xff]   ;;  %s1205_s18 = smov (!%p281_p9, %s994_s18), 3  ;;  %v906_v6 = vld [vmem:[%s1129_s13 + $0x58] sm:$0xff]   ;;  %v908_v8 = vld [vmem:[%s1129_s13 + $0x60] sm:$0xff]  }
  0x36   : > { %801 = vmatprep.subr.bf16.mxu0 %v902_v2  ;;  %828 = vmatprep.subr.bf16.mxu1 %v902_v2  ;;  %v907_v7 = vld [vmem:[%s1129_s13 + $0x18] sm:$0xff]   ;;  %s782_s26 = sshll.u32 %s1205_s18, 5  ;;  %v909_v9 = vld [vmem:[%s1129_s13 + $0x20] sm:$0xff]   ;;  %v910_v10 = vld [vmem:[%s1129_s13 + $0x68] sm:$0xff]   ;;  %s783_s11 = sshll.u32 %s1205_s18, 4 }
  0x37   : > { %s289_s10 = scalar_lea.vmem %s1189_s0, %s782_s26  ;;  %v911_v13 = vld [vmem:[%s1129_s13 + $0x28] sm:$0xff]   ;;  %v912_v14 = vld [vmem:[%s1129_s13 + $0x70] sm:$0xff]   ;;  %v914_v16 = vld [vmem:[%s1129_s13 + $0x78] sm:$0xff]   ;;  %s299_s21 = scalar_lea.vmem %s1191_s2, %s783_s11 }
  0x38   : > { %v918_v11 = vld [vmem:[%s289_s10 + $0x4] ss:$8 sps:$4 sm:$0xff]   ;;  %v921_v12 = vld [vmem:[%s289_s10 + $0x14] ss:$8 sps:$4 sm:$0xff]   ;;  %v916_v18 = vld [vmem:[%s289_s10] ss:$8 sps:$4 sm:$0xff]   ;;  %s306_s25 = scalar_lea.vmem %s1192_s3, %s1205_s18  ;;  %s312_s30 = scalar_lea.vmem %s1193_s4, %s1205_s18 }
  0x39   : > { %802 = vmatpush3.bf16.msra.mxu0 %v903_v3  ;;  %836 = vmatpush3.bf16.msra.mxu1 %v903_v3  ;;  %v913_v15 = vld [vmem:[%s1129_s13 + $0x30] sm:$0xff]   ;;  %v915_v17 = vld [vmem:[%s1129_s13 + $0x38] sm:$0xff]  }
  0x3a   : > { %803 = vmatprep.subr.bf16.mxu0 %v904_v4  ;;  %829 = vmatprep.subr.bf16.mxu1 %v904_v4  ;;  %v919_v19 = vld [vmem:[%s289_s10 + $0x10] ss:$8 sps:$4 sm:$0xff]  }
  0x3b   : > { %498 = vmatprep.mubr.bf16.mxu0 %v918_v11  ;;  %506 = vmatprep.mubr.bf16.mxu1 %v921_v12 }
  0x3d   : > { %804 = vmatpush3.bf16.msra.mxu0 %v905_v5  ;;  %837 = vmatpush3.bf16.msra.mxu1 %v905_v5 }
  0x3e   : > { %805 = vmatprep.subr.bf16.mxu0 %v906_v6  ;;  %830 = vmatprep.subr.bf16.mxu1 %v906_v6 }
  0x41   : > { %806 = vmatpush3.bf16.msra.mxu0 %v907_v7  ;;  %838 = vmatpush3.bf16.msra.mxu1 %v907_v7 }
  0x42   : > { %807 = vmatprep.subr.bf16.mxu0 %v908_v8  ;;  %831 = vmatprep.subr.bf16.mxu1 %v908_v8 }
  0x45   : > { %808 = vmatpush3.bf16.msra.mxu0 %v909_v9  ;;  %839 = vmatpush3.bf16.msra.mxu1 %v909_v9 }
  0x46   : > { %809 = vmatprep.subr.bf16.mxu0 %v910_v10  ;;  %832 = vmatprep.subr.bf16.mxu1 %v910_v10 }
  0x49   : > { %810 = vmatpush3.bf16.msra.mxu0 %v911_v13  ;;  %840 = vmatpush3.bf16.msra.mxu1 %v911_v13 }
  0x4a   : > { %811 = vmatprep.subr.bf16.mxu0 %v912_v14  ;;  %833 = vmatprep.subr.bf16.mxu1 %v912_v14 }
  0x4d   : > { %812 = vmatpush3.bf16.msra.mxu0 %v913_v15  ;;  %841 = vmatpush3.bf16.msra.mxu1 %v913_v15 }
  0x4e   : > { %813 = vmatprep.subr.bf16.mxu0 %v914_v16  ;;  %834 = vmatprep.subr.bf16.mxu1 %v914_v16 }
  0x51   : > { %814 = vmatpush3.bf16.msra.mxu0 %v915_v17  ;;  %842 = vmatpush3.bf16.msra.mxu1 %v915_v17 }
  0x54   : > { %499 = vmatmul.mubr.bf16.vlgmr.msra.gmra.mrb[0].mxu0 %v916_v18  ;;  %507 = vmatmul.mubr.bf16.vlgmr.msra.gmra.mrb[0].mxu1 %v919_v19 }
 0x127   : > { %v815_v20 = vpop.f32.mrb[0].mxu0  ;;  %v821_v21 = vpop.f32.mrb[0].mxu1 }
 0x128   : > { %v816_v22 = vpop.f32.mrb[1].mxu0  ;;  %v822_v23 = vpop.f32.mrb[1].mxu1 }
 0x129   : > { %v817_v24 = vadd.f32 %v816_v22, %v815_v20  ;;  %v818_v25 = vpop.f32.mrb[2].mxu0  ;;  %v823_v26 = vadd.f32 %v822_v23, %v821_v21  ;;  %v824_v27 = vpop.f32.mrb[2].mxu1 }
 0x12a   : > { %v819_v28 = vpop.f32.mrb[3].mxu0  ;;  %v825_v29 = vpop.f32.mrb[3].mxu1 }
 0x12b   : > { %v820_v30 = vadd.f32 %v819_v28, %v818_v25  ;;  %v826_v31 = vadd.f32 %v825_v29, %v824_v27  ;;  %v545_v32 = vmul.f32 %v817_v24, %v817_v24  ;;  %v547_v33 = vmul.f32 %v823_v26, %v823_v26 }
 0x12d   : > { %v791_v34 = vpack.c.bf16 %v820_v30, %v817_v24  ;;  %v535_v35 = vadd.f32 %v820_v30, %v817_v24  ;;  %v546_v36 = vmul.f32 %v820_v30, %v820_v30  ;;  %v796_v37 = vpack.c.bf16 %v826_v31, %v823_v26 }
 0x12e   : > { %v548_v41 = vmul.f32 %v826_v31, %v826_v31 }
 0x12f   : > { %792 = vst [vmem:[%s299_s21] sm:$0xff] %v791_v34   ;;  %v549_v38 = vadd.f32 %v546_v36, %v545_v32  ;;  %798 = vst [vmem:[%s299_s21 + $0x8] sm:$0xff] %v796_v37   ;;  %v536_v39 = vadd.f32 %v823_v26, %v535_v35 }
 0x131   : > { %v537_v40 = vadd.f32 %v826_v31, %v536_v39  ;;  %v550_v42 = vadd.f32 %v549_v38, %v547_v33 }
 0x133   : > { %v538_v43 = vrot.slane %v537_v40, 4  ;;  %v551_v44 = vadd.f32 %v550_v42, %v548_v41 }
 0x135   : > { %v539_v45 = vadd.f32 %v538_v43, %v537_v40  ;;  %v552_v46 = vrot.slane %v551_v44, 4 }
 0x137   : > { %v540_v47 = vrot.slane %v539_v45, 2  ;;  %v553_v48 = vadd.f32 %v552_v46, %v551_v44 }
 0x139   : > { %v541_v49 = vadd.f32 %v540_v47, %v539_v45  ;;  %v554_v50 = vrot.slane %v553_v48, 2 }
 0x13b   : > { %v542_v51 = vrot.slane %v541_v49, 1  ;;  %v555_v52 = vadd.f32 %v554_v50, %v553_v48 }
 0x13d   : > { %v543_v53 = vadd.f32 %v542_v51, %v541_v49  ;;  %v556_v54 = vrot.slane %v555_v52, 1 }
 0x13f   : > { %544 = vst [vmem:[%s306_s25] sm:$0x1] %v543_v53  ;;  %v557_v55 = vadd.f32 %v556_v54, %v555_v52 }
 0x141   : > { %558 = vst [vmem:[%s312_s30] sm:$0x1] %v557_v55 }
 0x142 PF: > { %s18_s20 = sadd.s32 1, %s1002_s20   ;;  %s1197_s15 = smov %s986_s16 }
 0x143   : > { %p15_p7 = scmp.ge.s32.totalorder %s18_s20, 6   ;;  %s1198_s16 = smov %s990_s17 }
 0x144   : > { %s1199_s17 = smov %s1081_s27  ;;  %s1200_s18 = smov %s998_s19 }
 0x145   : > { %s1201_s19 = smov %s1203_s22  ;;  %17 = sbr.rel (!%p15_p7) target bundleno = 4 (0x4), region = 95 }
 0x14c   :  { %625 = vsyncpa [#allocation3], 1 }
 0x14d   :  { %627 = vsyncpa [#allocation3 + $0x1], 1 }

// kernel: generator_forward.5
= control target key start
LH: loop header
LB: loop body
LE: loop exit
PB: predicated region body
PF: predicated region fallthrough
CT: control target
= control target key end

     0   :  { %v977_v3 = vmov 0   ;;  %s1271_s1 = inlined_call_operand.vmem [shape: bf16[1,128,1024], index: 1, kind: input, shape index: {}]   ;;  %s1272_s0 = inlined_call_operand.vmem [shape: bf16[1,16,128], index: 0, kind: input, shape index: {}]   ;;  %s1273_s2 = inlined_call_operand.vmem [shape: bf16[1,16,1024], index: 2, kind: output, shape index: {0}]   ;;  %s1274_s3 = inlined_call_operand.vmem [shape: f32[1,1,1,1024], index: 3, kind: output, shape index: {1}]   ;;  %s1275_s4 = inlined_call_operand.vmem [shape: f32[1,1,1,1024], index: 4, kind: output, shape index: {2}]  }
   0x1   :  { %v17_v0 = vld [vmem:[%s1271_s1] sm:$0xff]  ;;  %v18_v2 = vld [vmem:[%s1271_s1 + $0x8] sm:$0xff]  ;;  %439 = vmatprep.mubr.bf16.mxu0 %v977_v3  ;;  %482 = vmatprep.mubr.bf16.mxu1 %v977_v3  ;;  %v19_v63 = vld [vmem:[%s1271_s1 + $0x10] sm:$0xff] }
   0x2   :  { %v21_v1 = vld [vmem:[%s1271_s1 + $0x20] sm:$0xff]  ;;  %v22_v5 = vld [vmem:[%s1271_s1 + $0x28] sm:$0xff] }
   0x3   :  { %v895_v4 = vcombine.high %v17_v0, %v21_v1  ;;  %v894_v6 = vcombine.low %v17_v0, %v21_v1  ;;  %v25_v7 = vld [vmem:[%s1271_s1 + $0x40] sm:$0xff]  ;;  %v897_v9 = vcombine.high %v18_v2, %v22_v5  ;;  %v896_v10 = vcombine.low %v18_v2, %v22_v5  ;;  %v26_v12 = vld [vmem:[%s1271_s1 + $0x48] sm:$0xff]  ;;  %v23_v0 = vld [vmem:[%s1271_s1 + $0x30] sm:$0xff] }
   0x4   :  { %v29_v8 = vld [vmem:[%s1271_s1 + $0x60] sm:$0xff]  ;;  %v30_v13 = vld [vmem:[%s1271_s1 + $0x68] sm:$0xff]  ;;  %v20_v1 = vld [vmem:[%s1271_s1 + $0x18] sm:$0xff] }
   0x5   :  { %v903_v11 = vcombine.high %v25_v7, %v29_v8  ;;  %v33_v14 = vld [vmem:[%s1271_s1 + $0x80] sm:$0xff]  ;;  %407 = vmatprep.subr.bf16.mxu0 %v895_v4  ;;  %v905_v15 = vcombine.high %v26_v12, %v30_v13  ;;  %v34_v17 = vld [vmem:[%s1271_s1 + $0x88] sm:$0xff]  ;;  %450 = vmatprep.subr.bf16.mxu1 %v897_v9  ;;  %v902_v19 = vcombine.low %v25_v7, %v29_v8  ;;  %v24_v2 = vld [vmem:[%s1271_s1 + $0x38] sm:$0xff] }
   0x6   :  { %v37_v16 = vld [vmem:[%s1271_s1 + $0xa0] sm:$0xff]  ;;  %v38_v18 = vld [vmem:[%s1271_s1 + $0xa8] sm:$0xff]  ;;  %408 = vmatpush1.bf16.msra.mxu0 %v894_v6  ;;  %451 = vmatpush1.bf16.msra.mxu1 %v896_v10  ;;  %v904_v20 = vcombine.low %v26_v12, %v30_v13  ;;  %v899_v6 = vcombine.high %v19_v63, %v23_v0  ;;  %v901_v7 = vcombine.high %v20_v1, %v24_v2  ;;  %v27_v8 = vld [vmem:[%s1271_s1 + $0x50] sm:$0xff] }
   0x7   :  { %409 = vmatprep.subr.bf16.mxu0 %v903_v11  ;;  %v911_v21 = vcombine.high %v33_v14, %v37_v16  ;;  %452 = vmatprep.subr.bf16.mxu1 %v905_v15  ;;  %v913_v22 = vcombine.high %v34_v17, %v38_v18  ;;  %v41_v23 = vld [vmem:[%s1271_s1 + $0xc0] sm:$0xff]  ;;  %v42_v25 = vld [vmem:[%s1271_s1 + $0xc8] sm:$0xff]  ;;  %v910_v27 = vcombine.low %v33_v14, %v37_v16  ;;  %v31_v9 = vld [vmem:[%s1271_s1 + $0x70] sm:$0xff] }
   0x8   :  { %v45_v24 = vld [vmem:[%s1271_s1 + $0xe0] sm:$0xff]  ;;  %v46_v26 = vld [vmem:[%s1271_s1 + $0xe8] sm:$0xff]  ;;  %v912_v28 = vcombine.low %v34_v17, %v38_v18  ;;  %v28_v11 = vld [vmem:[%s1271_s1 + $0x58] sm:$0xff]  ;;  %v898_v13 = vcombine.low %v19_v63, %v23_v0  ;;  %v900_v14 = vcombine.low %v20_v1, %v24_v2  ;;  %v907_v15 = vcombine.high %v27_v8, %v31_v9 }
   0x9   :  { %v919_v29 = vcombine.high %v41_v23, %v45_v24  ;;  %v921_v30 = vcombine.high %v42_v25, %v46_v26  ;;  %v49_v31 = vld [vmem:[%s1271_s1 + $0x100] sm:$0xff]  ;;  %v50_v33 = vld [vmem:[%s1271_s1 + $0x108] sm:$0xff]  ;;  %v918_v35 = vcombine.low %v41_v23, %v45_v24  ;;  %v920_v36 = vcombine.low %v42_v25, %v46_v26  ;;  %v32_v12 = vld [vmem:[%s1271_s1 + $0x78] sm:$0xff] }
   0xa   :  { %410 = vmatpush1.bf16.msra.mxu0 %v902_v19  ;;  %453 = vmatpush1.bf16.msra.mxu1 %v904_v20  ;;  %v53_v32 = vld [vmem:[%s1271_s1 + $0x120] sm:$0xff]  ;;  %v54_v34 = vld [vmem:[%s1271_s1 + $0x128] sm:$0xff]  ;;  %v909_v16 = vcombine.high %v28_v11, %v32_v12  ;;  %v35_v17 = vld [vmem:[%s1271_s1 + $0x90] sm:$0xff]  ;;  %v978_v2 = vmov 1966171168  }
   0xb   :  { %411 = vmatprep.subr.bf16.mxu0 %v911_v21  ;;  %454 = vmatprep.subr.bf16.mxu1 %v913_v22  ;;  %v927_v37 = vcombine.high %v49_v31, %v53_v32  ;;  %v929_v38 = vcombine.high %v50_v33, %v54_v34  ;;  %v57_v39 = vld [vmem:[%s1271_s1 + $0x140] sm:$0xff]  ;;  %v58_v41 = vld [vmem:[%s1271_s1 + $0x148] sm:$0xff]  ;;  %v926_v43 = vcombine.low %v49_v31, %v53_v32  ;;  %v39_v18 = vld [vmem:[%s1271_s1 + $0xb0] sm:$0xff] }
   0xc   :  { %v61_v40 = vld [vmem:[%s1271_s1 + $0x160] sm:$0xff]  ;;  %v62_v42 = vld [vmem:[%s1271_s1 + $0x168] sm:$0xff]  ;;  %v928_v44 = vcombine.low %v50_v33, %v54_v34  ;;  %v36_v19 = vld [vmem:[%s1271_s1 + $0x98] sm:$0xff]  ;;  %v906_v21 = vcombine.low %v27_v8, %v31_v9  ;;  %v908_v22 = vcombine.low %v28_v11, %v32_v12  ;;  %v915_v23 = vcombine.high %v35_v17, %v39_v18 }
   0xd   :  { %v935_v45 = vcombine.high %v57_v39, %v61_v40  ;;  %v937_v46 = vcombine.high %v58_v41, %v62_v42  ;;  %v65_v47 = vld [vmem:[%s1271_s1 + $0x180] sm:$0xff]  ;;  %v66_v49 = vld [vmem:[%s1271_s1 + $0x188] sm:$0xff]  ;;  %v934_v51 = vcombine.low %v57_v39, %v61_v40  ;;  %v936_v52 = vcombine.low %v58_v41, %v62_v42  ;;  %v40_v20 = vld [vmem:[%s1271_s1 + $0xb8] sm:$0xff] }
   0xe   :  { %412 = vmatpush1.bf16.msra.mxu0 %v910_v27  ;;  %455 = vmatpush1.bf16.msra.mxu1 %v912_v28  ;;  %v69_v48 = vld [vmem:[%s1271_s1 + $0x1a0] sm:$0xff]  ;;  %v70_v50 = vld [vmem:[%s1271_s1 + $0x1a8] sm:$0xff]  ;;  %v917_v24 = vcombine.high %v36_v19, %v40_v20  ;;  %v43_v25 = vld [vmem:[%s1271_s1 + $0xd0] sm:$0xff] }
   0xf   :  { %413 = vmatprep.subr.bf16.mxu0 %v919_v29  ;;  %456 = vmatprep.subr.bf16.mxu1 %v921_v30  ;;  %v943_v53 = vcombine.high %v65_v47, %v69_v48  ;;  %v945_v54 = vcombine.high %v66_v49, %v70_v50  ;;  %v73_v55 = vld [vmem:[%s1271_s1 + $0x1c0] sm:$0xff]  ;;  %v74_v57 = vld [vmem:[%s1271_s1 + $0x1c8] sm:$0xff]  ;;  %v942_v59 = vcombine.low %v65_v47, %v69_v48  ;;  %v47_v26 = vld [vmem:[%s1271_s1 + $0xf0] sm:$0xff] }
  0x10   :  { %v77_v56 = vld [vmem:[%s1271_s1 + $0x1e0] sm:$0xff]  ;;  %v78_v58 = vld [vmem:[%s1271_s1 + $0x1e8] sm:$0xff]  ;;  %v944_v60 = vcombine.low %v66_v49, %v70_v50  ;;  %v44_v27 = vld [vmem:[%s1271_s1 + $0xd8] sm:$0xff]  ;;  %v914_v29 = vcombine.low %v35_v17, %v39_v18  ;;  %v916_v30 = vcombine.low %v36_v19, %v40_v20  ;;  %v923_v31 = vcombine.high %v43_v25, %v47_v26 }
  0x11   :  { %v951_v61 = vcombine.high %v73_v55, %v77_v56  ;;  %v953_v62 = vcombine.high %v74_v57, %v78_v58  ;;  %v950_v4 = vcombine.low %v73_v55, %v77_v56  ;;  %v952_v5 = vcombine.low %v74_v57, %v78_v58  ;;  %v1123_v10 = vld [vmem:[%s1272_s0] sm:$0xff]   ;;  %v48_v28 = vld [vmem:[%s1271_s1 + $0xf8] sm:$0xff]  ;;  %v51_v33 = vld [vmem:[%s1271_s1 + $0x110] sm:$0xff] }
  0x12   :  { %414 = vmatpush1.bf16.msra.mxu0 %v918_v35  ;;  %457 = vmatpush1.bf16.msra.mxu1 %v920_v36  ;;  %v925_v32 = vcombine.high %v44_v27, %v48_v28  ;;  %v55_v34 = vld [vmem:[%s1271_s1 + $0x130] sm:$0xff]  ;;  %v56_v35 = vld [vmem:[%s1271_s1 + $0x138] sm:$0xff]  ;;  %v922_v36 = vcombine.low %v43_v25, %v47_v26 }
  0x13   :  { %415 = vmatprep.subr.bf16.mxu0 %v927_v37  ;;  %458 = vmatprep.subr.bf16.mxu1 %v929_v38  ;;  %v924_v37 = vcombine.low %v44_v27, %v48_v28  ;;  %v931_v38 = vcombine.high %v51_v33, %v55_v34  ;;  %v59_v40 = vld [vmem:[%s1271_s1 + $0x150] sm:$0xff]  ;;  %v60_v42 = vld [vmem:[%s1271_s1 + $0x158] sm:$0xff] }
  0x14   :  { %v63_v41 = vld [vmem:[%s1271_s1 + $0x170] sm:$0xff]  ;;  %v68_v50 = vld [vmem:[%s1271_s1 + $0x198] sm:$0xff] }
  0x15   :  { %v67_v48 = vld [vmem:[%s1271_s1 + $0x190] sm:$0xff]  ;;  %v76_v58 = vld [vmem:[%s1271_s1 + $0x1d8] sm:$0xff] }
  0x16   :  { %416 = vmatpush1.bf16.msra.mxu0 %v926_v43  ;;  %459 = vmatpush1.bf16.msra.mxu1 %v928_v44  ;;  %v64_v43 = vld [vmem:[%s1271_s1 + $0x178] sm:$0xff]  ;;  %v930_v44 = vcombine.low %v51_v33, %v55_v34  ;;  %v71_v49 = vld [vmem:[%s1271_s1 + $0x1b0] sm:$0xff] }
  0x17   :  { %417 = vmatprep.subr.bf16.mxu0 %v935_v45  ;;  %460 = vmatprep.subr.bf16.mxu1 %v937_v46  ;;  %v939_v46 = vcombine.high %v59_v40, %v63_v41  ;;  %v941_v47 = vcombine.high %v60_v42, %v64_v43  ;;  %v75_v56 = vld [vmem:[%s1271_s1 + $0x1d0] sm:$0xff] }
  0x18   :  { %v79_v57 = vld [vmem:[%s1271_s1 + $0x1f0] sm:$0xff] }
  0x19   :  { %v954_v0 = vcombine.low %v75_v56, %v79_v57 }
  0x1a   :  { %418 = vmatpush1.bf16.msra.mxu0 %v934_v51  ;;  %461 = vmatpush1.bf16.msra.mxu1 %v936_v52  ;;  %v72_v51 = vld [vmem:[%s1271_s1 + $0x1b8] sm:$0xff]  ;;  %v938_v52 = vcombine.low %v59_v40, %v63_v41 }
  0x1b   :  { %419 = vmatprep.subr.bf16.mxu0 %v943_v53  ;;  %462 = vmatprep.subr.bf16.mxu1 %v945_v54  ;;  %v940_v53 = vcombine.low %v60_v42, %v64_v43  ;;  %v947_v54 = vcombine.high %v67_v48, %v71_v49  ;;  %v949_v55 = vcombine.high %v68_v50, %v72_v51 }
  0x1e   :  { %420 = vmatpush1.bf16.msra.mxu0 %v942_v59  ;;  %463 = vmatpush1.bf16.msra.mxu1 %v944_v60  ;;  %v80_v59 = vld [vmem:[%s1271_s1 + $0x1f8] sm:$0xff]  ;;  %v946_v60 = vcombine.low %v67_v48, %v71_v49 }
  0x1f   :  { %421 = vmatprep.subr.bf16.mxu0 %v951_v61  ;;  %464 = vmatprep.subr.bf16.mxu1 %v953_v62  ;;  %v948_v61 = vcombine.low %v68_v50, %v72_v51  ;;  %v955_v62 = vcombine.high %v75_v56, %v79_v57  ;;  %v957_v63 = vcombine.high %v76_v58, %v80_v59 }
  0x20   :  { %v956_v1 = vcombine.low %v76_v58, %v80_v59 }
  0x22   :  { %422 = vmatpush1.bf16.msra.mxu0 %v950_v4  ;;  %465 = vmatpush1.bf16.msra.mxu1 %v952_v5  ;;  %v704_v4 = vunpack.c.l.s4 %v978_v2  ;;  %v706_v5 = vlaneseq }
  0x23   :  { %493 = vmatprep.subr.bf16.mxu0 %v899_v6  ;;  %536 = vmatprep.subr.bf16.mxu1 %v901_v7 }
  0x24   :  { %v705_v6 = vunpack.c.0.s8 %v704_v4  ;;  %v707_v7 = vshrl.u32 %v706_v5, 7 }
  0x25   :  { %440 = vmatmul.mubr.bf16.vlgmr.msra.gmra.mrb[0].mxu0 %v1123_v10  ;;  %483 = vmatmul.mubr.bf16.vlgmr.msra.gmra.mrb[0].mxu1 %v1123_v10 }
  0x26   :  { %494 = vmatpush1.bf16.msra.mxu0 %v898_v13  ;;  %537 = vmatpush1.bf16.msra.mxu1 %v900_v14  ;;  %v1209_v18 = vsub.s32 %v705_v6, %v707_v7 }
  0x27   :  { %495 = vmatprep.subr.bf16.mxu0 %v907_v15  ;;  %538 = vmatprep.subr.bf16.mxu1 %v909_v16 }
  0x28   :  { %525 = vmatprep.mubr.bf16.mxu0 %v977_v3  ;;  %568 = vmatprep.mubr.bf16.mxu1 %v977_v3  ;;  %v52_v3 = vld [vmem:[%s1271_s1 + $0x118] sm:$0xff] }
  0x29   :  { %v933_v39 = vcombine.high %v52_v3, %v56_v35  ;;  %v932_v45 = vcombine.low %v52_v3, %v56_v35 }
  0x2a   :  { %496 = vmatpush1.bf16.msra.mxu0 %v906_v21  ;;  %539 = vmatpush1.bf16.msra.mxu1 %v908_v22 }
  0x2b   :  { %497 = vmatprep.subr.bf16.mxu0 %v915_v23  ;;  %540 = vmatprep.subr.bf16.mxu1 %v917_v24 }
  0x2e   :  { %498 = vmatpush1.bf16.msra.mxu0 %v914_v29  ;;  %541 = vmatpush1.bf16.msra.mxu1 %v916_v30 }
  0x2f   :  { %499 = vmatprep.subr.bf16.mxu0 %v923_v31  ;;  %542 = vmatprep.subr.bf16.mxu1 %v925_v32 }
  0x32   :  { %500 = vmatpush1.bf16.msra.mxu0 %v922_v36  ;;  %543 = vmatpush1.bf16.msra.mxu1 %v924_v37 }
  0x33   :  { %501 = vmatprep.subr.bf16.mxu0 %v931_v38  ;;  %544 = vmatprep.subr.bf16.mxu1 %v933_v39 }
  0x36   :  { %502 = vmatpush1.bf16.msra.mxu0 %v930_v44  ;;  %545 = vmatpush1.bf16.msra.mxu1 %v932_v45 }
  0x37   :  { %503 = vmatprep.subr.bf16.mxu0 %v939_v46  ;;  %546 = vmatprep.subr.bf16.mxu1 %v941_v47 }
  0x3a   :  { %504 = vmatpush1.bf16.msra.mxu0 %v938_v52  ;;  %547 = vmatpush1.bf16.msra.mxu1 %v940_v53 }
  0x3b   :  { %505 = vmatprep.subr.bf16.mxu0 %v947_v54  ;;  %548 = vmatprep.subr.bf16.mxu1 %v949_v55 }
  0x3e   :  { %506 = vmatpush1.bf16.msra.mxu0 %v946_v60  ;;  %549 = vmatpush1.bf16.msra.mxu1 %v948_v61 }
  0x3f   :  { %507 = vmatprep.subr.bf16.mxu0 %v955_v62  ;;  %550 = vmatprep.subr.bf16.mxu1 %v957_v63 }
  0x42   :  { %508 = vmatpush1.bf16.msra.mxu0 %v954_v0  ;;  %551 = vmatpush1.bf16.msra.mxu1 %v956_v1 }
  0x45   :  { %526 = vmatmul.mubr.bf16.vlgmr.msra.gmra.mrb[4].mxu0 %v1123_v10  ;;  %569 = vmatmul.mubr.bf16.vlgmr.msra.gmra.mrb[4].mxu1 %v1123_v10 }
  0xf8   :  { %v441_v8 = vpop.f32.mrb[0].mxu0  ;;  %v484_v11 = vpop.f32.mrb[0].mxu1 }
  0xf9   :  { %v750_v9 = vmul.f32 %v441_v8, %v441_v8  ;;  %v443_v12 = vpop.f32.mrb[1].mxu0  ;;  %v752_v13 = vmul.f32 %v484_v11, %v484_v11  ;;  %v486_v16 = vpop.f32.mrb[1].mxu1 }
  0xfa   :  { %v966_v14 = vpack.c.bf16 %v443_v12, %v441_v8  ;;  %v751_v15 = vmul.f32 %v443_v12, %v443_v12  ;;  %v445_v17 = vpop.f32.mrb[2].mxu0  ;;  %v967_v19 = vpack.c.bf16 %v486_v16, %v484_v11  ;;  %v753_v20 = vmul.f32 %v486_v16, %v486_v16  ;;  %v488_v22 = vpop.f32.mrb[2].mxu1 }
  0xfb   :  { %v635_v21 = vadd.f32 %v445_v17, %v441_v8  ;;  %v758_v10 = vmul.f32 %v445_v17, %v445_v17  ;;  %v447_v23 = vpop.f32.mrb[3].mxu0  ;;  %v649_v24 = vadd.f32 %v488_v22, %v484_v11  ;;  %v760_v25 = vmul.f32 %v488_v22, %v488_v22  ;;  %v490_v28 = vpop.f32.mrb[3].mxu1 }
  0xfc   :  { %627 = vst [vmem:[%s1273_s2] sm:$0xff] %v966_v14  ;;  %v970_v26 = vpack.c.bf16 %v447_v23, %v445_v17  ;;  %v642_v27 = vadd.f32 %v447_v23, %v443_v12  ;;  %628 = vst [vmem:[%s1273_s2 + $0x8] sm:$0xff] %v967_v19  ;;  %v759_v31 = vmul.f32 %v447_v23, %v447_v23 }
  0xfd   :  { %v636_v29 = vrot.slane %v635_v21, 4  ;;  %v766_v30 = vadd.f32 %v758_v10, %v750_v9  ;;  %v971_v32 = vpack.c.bf16 %v490_v28, %v488_v22  ;;  %v650_v33 = vrot.slane %v649_v24, 4 }
  0xfe   :  { %v780_v34 = vadd.f32 %v760_v25, %v752_v13  ;;  %631 = vst [vmem:[%s1273_s2 + $0x20] sm:$0xff] %v970_v26  ;;  %v643_v3 = vrot.slane %v642_v27, 4  ;;  %v656_v35 = vadd.f32 %v490_v28, %v486_v16  ;;  %v773_v38 = vadd.f32 %v759_v31, %v751_v15 }
  0xff   :  { %v637_v36 = vadd.f32 %v636_v29, %v635_v21  ;;  %v767_v37 = vrot.slane %v766_v30, 4  ;;  %632 = vst [vmem:[%s1273_s2 + $0x28] sm:$0xff] %v971_v32  ;;  %v761_v39 = vmul.f32 %v490_v28, %v490_v28  ;;  %v651_v40 = vadd.f32 %v650_v33, %v649_v24 }
 0x100   :  { %v781_v41 = vrot.slane %v780_v34, 4  ;;  %v644_v42 = vadd.f32 %v643_v3, %v642_v27  ;;  %v657_v43 = vrot.slane %v656_v35, 4  ;;  %v774_v46 = vrot.slane %v773_v38, 4 }
 0x101   :  { %v638_v44 = vrot.slane %v637_v36, 2  ;;  %v768_v45 = vadd.f32 %v767_v37, %v766_v30  ;;  %v787_v47 = vadd.f32 %v761_v39, %v753_v20  ;;  %v652_v48 = vrot.slane %v651_v40, 2 }
 0x102   :  { %v782_v49 = vadd.f32 %v781_v41, %v780_v34  ;;  %v645_v50 = vrot.slane %v644_v42, 2  ;;  %v658_v51 = vadd.f32 %v657_v43, %v656_v35  ;;  %v775_v54 = vadd.f32 %v774_v46, %v773_v38 }
 0x103   :  { %v639_v52 = vadd.f32 %v638_v44, %v637_v36  ;;  %v769_v53 = vrot.slane %v768_v45, 2  ;;  %v788_v55 = vrot.slane %v787_v47, 4  ;;  %v653_v56 = vadd.f32 %v652_v48, %v651_v40 }
 0x104   :  { %v783_v57 = vrot.slane %v782_v49, 2  ;;  %v646_v58 = vadd.f32 %v645_v50, %v644_v42  ;;  %v659_v59 = vrot.slane %v658_v51, 2  ;;  %v776_v62 = vrot.slane %v775_v54, 2 }
 0x105   :  { %v640_v60 = vrot.slane %v639_v52, 1  ;;  %v770_v61 = vadd.f32 %v769_v53, %v768_v45  ;;  %v789_v63 = vadd.f32 %v788_v55, %v787_v47  ;;  %v654_v0 = vrot.slane %v653_v56, 1 }
 0x106   :  { %v784_v1 = vadd.f32 %v783_v57, %v782_v49  ;;  %v647_v2 = vrot.slane %v646_v58, 1  ;;  %v660_v4 = vadd.f32 %v659_v59, %v658_v51  ;;  %v777_v7 = vadd.f32 %v776_v62, %v775_v54 }
 0x107   :  { %v641_v5 = vadd.f32 %v640_v60, %v639_v52  ;;  %v771_v6 = vrot.slane %v770_v61, 1  ;;  %v790_v8 = vrot.slane %v789_v63, 2  ;;  %v655_v9 = vadd.f32 %v654_v0, %v653_v56 }
 0x108   :  { %v785_v11 = vrot.slane %v784_v1, 1  ;;  %v648_v12 = vadd.f32 %v647_v2, %v646_v58  ;;  %v661_v13 = vrot.slane %v660_v4, 1  ;;  %v778_v15 = vrot.slane %v777_v7, 1 }
 0x109   :  { %v772_v14 = vadd.f32 %v771_v6, %v770_v61  ;;  %v791_v16 = vadd.f32 %v790_v8, %v789_v63 }
 0x10a   :  { %v699_v17 = vcombine.low %v641_v5, %v648_v12  ;;  %v662_v19 = vadd.f32 %v661_v13, %v660_v4  ;;  %v786_v20 = vadd.f32 %v785_v11, %v784_v1  ;;  %v779_v21 = vadd.f32 %v778_v15, %v777_v7 }
 0x10b   :  { %v792_v10 = vrot.slane %v791_v16, 1 }
 0x10c   :  { %v1224_v22 = vrot.slane %v699_v17, %v1209_v18  ;;  %v700_v23 = vcombine.low %v655_v9, %v662_v19  ;;  %v830_v24 = vcombine.low %v772_v14, %v779_v21 }
 0x10d   :  { %v793_v25 = vadd.f32 %v792_v10, %v791_v16 }
 0x10e   :  { %v1227_v26 = vrot.slane %v700_v23, %v1209_v18  ;;  %v1230_v27 = vrot.slane %v830_v24, %v1209_v18 }
 0x10f   :  { %v831_v28 = vcombine.low %v786_v20, %v793_v25 }
 0x110   :  { %v731_v29 = vcombine.low %v1224_v22, %v1227_v26 }
 0x111   :  { %v1235_v30 = vrot.slane %v831_v28, %v1209_v18 }
 0x113   :  { %v862_v31 = vcombine.low %v1230_v27, %v1235_v30 }
 0x118   :  { %v527_v32 = vpop.f32.mrb[4].mxu0  ;;  %v570_v33 = vpop.f32.mrb[4].mxu1 }
 0x119   :  { %v529_v34 = vpop.f32.mrb[5].mxu0  ;;  %v754_v3 = vmul.f32 %v527_v32, %v527_v32  ;;  %v756_v35 = vmul.f32 %v570_v33, %v570_v33  ;;  %v572_v38 = vpop.f32.mrb[5].mxu1 }
 0x11a   :  { %v968_v36 = vpack.c.bf16 %v529_v34, %v527_v32  ;;  %v755_v37 = vmul.f32 %v529_v34, %v529_v34  ;;  %v531_v39 = vpop.f32.mrb[6].mxu0  ;;  %v969_v40 = vpack.c.bf16 %v572_v38, %v570_v33  ;;  %v757_v41 = vmul.f32 %v572_v38, %v572_v38  ;;  %v574_v44 = vpop.f32.mrb[6].mxu1 }
 0x11b   :  { %v663_v42 = vadd.f32 %v531_v39, %v527_v32  ;;  %v762_v43 = vmul.f32 %v531_v39, %v531_v39  ;;  %v533_v45 = vpop.f32.mrb[7].mxu0  ;;  %v677_v46 = vadd.f32 %v574_v44, %v570_v33  ;;  %v764_v47 = vmul.f32 %v574_v44, %v574_v44  ;;  %v576_v50 = vpop.f32.mrb[7].mxu1 }
 0x11c   :  { %629 = vst [vmem:[%s1273_s2 + $0x10] sm:$0xff] %v968_v36  ;;  %v972_v48 = vpack.c.bf16 %v533_v45, %v531_v39  ;;  %v670_v49 = vadd.f32 %v533_v45, %v529_v34  ;;  %630 = vst [vmem:[%s1273_s2 + $0x18] sm:$0xff] %v969_v40  ;;  %v763_v53 = vmul.f32 %v533_v45, %v533_v45 }
 0x11d   :  { %v664_v51 = vrot.slane %v663_v42, 4  ;;  %v794_v52 = vadd.f32 %v762_v43, %v754_v3  ;;  %v973_v54 = vpack.c.bf16 %v576_v50, %v574_v44  ;;  %v678_v55 = vrot.slane %v677_v46, 4 }
 0x11e   :  { %v808_v56 = vadd.f32 %v764_v47, %v756_v35  ;;  %633 = vst [vmem:[%s1273_s2 + $0x30] sm:$0xff] %v972_v48  ;;  %v671_v57 = vrot.slane %v670_v49, 4  ;;  %v684_v58 = vadd.f32 %v576_v50, %v572_v38  ;;  %v801_v61 = vadd.f32 %v763_v53, %v755_v37 }
 0x11f   :  { %v665_v59 = vadd.f32 %v664_v51, %v663_v42  ;;  %v795_v60 = vrot.slane %v794_v52, 4  ;;  %634 = vst [vmem:[%s1273_s2 + $0x38] sm:$0xff] %v973_v54  ;;  %v765_v62 = vmul.f32 %v576_v50, %v576_v50  ;;  %v679_v63 = vadd.f32 %v678_v55, %v677_v46 }
 0x120   :  { %v809_v0 = vrot.slane %v808_v56, 4  ;;  %v672_v1 = vadd.f32 %v671_v57, %v670_v49  ;;  %v685_v2 = vrot.slane %v684_v58, 4  ;;  %v802_v6 = vrot.slane %v801_v61, 4 }
 0x121   :  { %v666_v4 = vrot.slane %v665_v59, 2  ;;  %v796_v5 = vadd.f32 %v795_v60, %v794_v52  ;;  %v815_v7 = vadd.f32 %v765_v62, %v757_v41  ;;  %v680_v8 = vrot.slane %v679_v63, 2 }
 0x122   :  { %v810_v9 = vadd.f32 %v809_v0, %v808_v56  ;;  %v673_v11 = vrot.slane %v672_v1, 2  ;;  %v686_v12 = vadd.f32 %v685_v2, %v684_v58  ;;  %v803_v15 = vadd.f32 %v802_v6, %v801_v61 }
 0x123   :  { %v667_v13 = vadd.f32 %v666_v4, %v665_v59  ;;  %v797_v14 = vrot.slane %v796_v5, 2  ;;  %v816_v16 = vrot.slane %v815_v7, 4  ;;  %v681_v17 = vadd.f32 %v680_v8, %v679_v63 }
 0x124   :  { %v811_v19 = vrot.slane %v810_v9, 2  ;;  %v674_v20 = vadd.f32 %v673_v11, %v672_v1  ;;  %v687_v21 = vrot.slane %v686_v12, 2  ;;  %v804_v24 = vrot.slane %v803_v15, 2 }
 0x125   :  { %v668_v10 = vrot.slane %v667_v13, 1  ;;  %v798_v23 = vadd.f32 %v797_v14, %v796_v5  ;;  %v817_v25 = vadd.f32 %v816_v16, %v815_v7  ;;  %v682_v28 = vrot.slane %v681_v17, 1 }
 0x126   :  { %v812_v32 = vadd.f32 %v811_v19, %v810_v9  ;;  %v675_v33 = vrot.slane %v674_v20, 1  ;;  %v688_v34 = vadd.f32 %v687_v21, %v686_v12  ;;  %v805_v36 = vadd.f32 %v804_v24, %v803_v15 }
 0x127   :  { %v669_v3 = vadd.f32 %v668_v10, %v667_v13  ;;  %v799_v35 = vrot.slane %v798_v23, 1  ;;  %v818_v37 = vrot.slane %v817_v25, 2  ;;  %v683_v38 = vadd.f32 %v682_v28, %v681_v17 }
 0x128   :  { %v813_v39 = vrot.slane %v812_v32, 1  ;;  %v676_v40 = vadd.f32 %v675_v33, %v674_v20  ;;  %v689_v41 = vrot.slane %v688_v34, 1  ;;  %v806_v43 = vrot.slane %v805_v36, 1 }
 0x129   :  { %v800_v42 = vadd.f32 %v799_v35, %v798_v23  ;;  %v819_v44 = vadd.f32 %v818_v37, %v817_v25  ;;  %v739_v59 = vrot.slane %v731_v29, %v1209_v18  ;;  %v870_v63 = vrot.slane %v862_v31, %v1209_v18 }
 0x12a   :  { %v701_v45 = vcombine.low %v669_v3, %v676_v40  ;;  %v690_v46 = vadd.f32 %v689_v41, %v688_v34  ;;  %v814_v47 = vadd.f32 %v813_v39, %v812_v32  ;;  %v807_v48 = vadd.f32 %v806_v43, %v805_v36 }
 0x12b   :  { %v820_v49 = vrot.slane %v819_v44, 1 }
 0x12c   :  { %v723_v50 = vrot.slane %v701_v45, %v1209_v18  ;;  %v702_v51 = vcombine.low %v683_v38, %v690_v46  ;;  %v832_v52 = vcombine.low %v800_v42, %v807_v48 }
 0x12d   :  { %v821_v53 = vadd.f32 %v820_v49, %v819_v44 }
 0x12e   :  { %v730_v54 = vrot.slane %v702_v51, %v1209_v18  ;;  %v854_v55 = vrot.slane %v832_v52, %v1209_v18 }
 0x12f   :  { %v833_v56 = vcombine.low %v814_v47, %v821_v53 }
 0x130   :  { %v732_v57 = vcombine.low %v723_v50, %v730_v54 }
 0x131   :  { %v861_v58 = vrot.slane %v833_v56, %v1209_v18 }
 0x132   :  { %v746_v60 = vrot.slane %v732_v57, %v1209_v18 }
 0x133   :  { %v863_v61 = vcombine.low %v854_v55, %v861_v58 }
 0x134   :  { %v747_v62 = vcombine.low %v739_v59, %v746_v60 }
 0x135   :  { %v877_v0 = vrot.slane %v863_v61, %v1209_v18 }
 0x136   :  { %749 = vst [vmem:[%s1274_s3] sm:$0xff] %v747_v62 }
 0x137   :  { %v878_v1 = vcombine.low %v870_v63, %v877_v0 }
 0x139   :  { %880 = vst [vmem:[%s1275_s4] sm:$0xff] %v878_v1 }

// kernel: generator_forward.7
= control target key start
LH: loop header
LB: loop body
LE: loop exit
PB: predicated region body
PF: predicated region fallthrough
CT: control target
= control target key end

     0   :  { %s1089_s15 = smov 0   ;;  %s1091_s16 = smov 0   ;;  %s1171_s0 = inlined_call_operand.vmem [shape: bf16[4,128,128], index: 0, kind: input, shape index: {}]   ;;  %s1172_s1 = inlined_call_operand.vmem [shape: bf16[4,128,128], index: 1, kind: input, shape index: {}]   ;;  %s1173_s2 = inlined_call_operand.vmem [shape: bf16[4,128,128], index: 2, kind: output, shape index: {0}]   ;;  %s1174_s3 = inlined_call_operand.vmem [shape: f32[4,1,1,128], index: 3, kind: output, shape index: {1}]   ;;  %s1175_s4 = inlined_call_operand.vmem [shape: f32[4,1,1,128], index: 4, kind: output, shape index: {2}]  }
   0x1   :  { %s1093_s17 = smov 0  }
   0x2 LB: > { %s27_s18 = sadd.s32 1, %s1058_s16  ;;  %p829_p0 = scmp.ge.s32.totalorder %s1062_s17, 1  ;;  %s1062_s17 = sphi %s1093_s17, %s15_s17   ;;  %s1058_s16 = sphi %s1091_s16, %s1177_s16   ;;  %s1054_s15 = sphi %s1089_s15, %s1176_s15  }
   0x3   : > { %p29_p1 = scmp.ge.s32.totalorder %s27_s18, 4  ;;  %p202_p2 = scmp.lt.s32.totalorder %s1062_s17, 5 }
   0x5   : > { %s1179_s18 = smov (%p29_p1, %s27_s18), 0  ;;  %p203_p3 = pnand %p829_p0, %p202_p2 }
   0x6   : > { %p254_p4 = scmp.lt.s32.totalorder (!%p203_p3), %s1054_s15, 3 }
   0x7   : > { %206 = sbr.rel (%p203_p3) target bundleno = 310 (0x136), region = 28 }
   0xe   : > { %s1181_s15 = smov (!%p254_p4, %s1054_s15), 3 }
   0xf   : > { %s1110_s19 = sshll.u32 %s1181_s15, 6  ;;  %s283_s5 = scalar_lea.vmem %s1174_s3, %s1181_s15 }
  0x10   : > { %s1116_s22 = scalar_lea.vmem %s1172_s1, %s1110_s19  ;;  %s1125_s25 = scalar_lea.vmem %s1171_s0, %s1110_s19 }
  0x11   : > { %v1024_v0 = vld [vmem:[%s1116_s22] sm:$0xff]   ;;  %v1025_v1 = vld [vmem:[%s1116_s22 + $0x8] sm:$0xff]   ;;  %v1026_v2 = vld [vmem:[%s1116_s22 + $0x10] sm:$0xff]   ;;  %s1144_s28 = scalar_lea.vmem %s1173_s2, %s1110_s19  ;;  %s289_s8 = scalar_lea.vmem %s1175_s4, %s1181_s15 }
  0x12   : > { %952 = vmatprep.subr.bf16.mxu0 %v1024_v0  ;;  %984 = vmatprep.subr.bf16.mxu1 %v1024_v0  ;;  %v1027_v3 = vld [vmem:[%s1116_s22 + $0x18] sm:$0xff]   ;;  %v1032_v4 = vld [vmem:[%s1125_s25] sm:$0xff]   ;;  %v1029_v7 = vld [vmem:[%s1116_s22 + $0x28] sm:$0xff]  }
  0x13   : > { %953 = vmatpush3.bf16.msra.mxu0 %v1024_v0  ;;  %992 = vmatpush3.bf16.msra.mxu1 %v1024_v0  ;;  %v1028_v5 = vld [vmem:[%s1116_s22 + $0x20] sm:$0xff]   ;;  %v1030_v8 = vld [vmem:[%s1116_s22 + $0x30] sm:$0xff]   ;;  %v1031_v9 = vld [vmem:[%s1116_s22 + $0x38] sm:$0xff]  }
  0x14   : > { %954 = vmatprep.subr.bf16.mxu0 %v1025_v1  ;;  %985 = vmatprep.subr.bf16.mxu1 %v1025_v1  ;;  %v1036_v6 = vld [vmem:[%s1125_s25 + $0x20] sm:$0xff]   ;;  %v1033_v10 = vld [vmem:[%s1125_s25 + $0x8] sm:$0xff]   ;;  %v1034_v12 = vld [vmem:[%s1125_s25 + $0x10] sm:$0xff]  }
  0x15   : > { %968 = vmatprep.mubr.bf16.mxu0 %v1032_v4  ;;  %976 = vmatprep.mubr.bf16.mxu1 %v1036_v6  ;;  %v1037_v11 = vld [vmem:[%s1125_s25 + $0x28] sm:$0xff]   ;;  %v1038_v13 = vld [vmem:[%s1125_s25 + $0x30] sm:$0xff]   ;;  %v1035_v14 = vld [vmem:[%s1125_s25 + $0x18] sm:$0xff]  }
  0x16   : > { %v1039_v15 = vld [vmem:[%s1125_s25 + $0x38] sm:$0xff]  }
  0x17   : > { %955 = vmatpush3.bf16.msra.mxu0 %v1025_v1  ;;  %993 = vmatpush3.bf16.msra.mxu1 %v1025_v1 }
  0x18   : > { %956 = vmatprep.subr.bf16.mxu0 %v1026_v2  ;;  %986 = vmatprep.subr.bf16.mxu1 %v1026_v2 }
  0x1b   : > { %957 = vmatpush3.bf16.msra.mxu0 %v1026_v2  ;;  %994 = vmatpush3.bf16.msra.mxu1 %v1026_v2 }
  0x1c   : > { %958 = vmatprep.subr.bf16.mxu0 %v1027_v3  ;;  %987 = vmatprep.subr.bf16.mxu1 %v1027_v3 }
  0x1f   : > { %959 = vmatpush3.bf16.msra.mxu0 %v1027_v3  ;;  %995 = vmatpush3.bf16.msra.mxu1 %v1027_v3 }
  0x20   : > { %960 = vmatprep.subr.bf16.mxu0 %v1028_v5  ;;  %988 = vmatprep.subr.bf16.mxu1 %v1028_v5 }
  0x23   : > { %961 = vmatpush3.bf16.msra.mxu0 %v1028_v5  ;;  %996 = vmatpush3.bf16.msra.mxu1 %v1028_v5 }
  0x24   : > { %962 = vmatprep.subr.bf16.mxu0 %v1029_v7  ;;  %989 = vmatprep.subr.bf16.mxu1 %v1029_v7 }
  0x27   : > { %963 = vmatpush3.bf16.msra.mxu0 %v1029_v7  ;;  %997 = vmatpush3.bf16.msra.mxu1 %v1029_v7 }
  0x28   : > { %964 = vmatprep.subr.bf16.mxu0 %v1030_v8  ;;  %990 = vmatprep.subr.bf16.mxu1 %v1030_v8 }
  0x2b   : > { %965 = vmatpush3.bf16.msra.mxu0 %v1030_v8  ;;  %998 = vmatpush3.bf16.msra.mxu1 %v1030_v8 }
  0x2c   : > { %966 = vmatprep.subr.bf16.mxu0 %v1031_v9  ;;  %991 = vmatprep.subr.bf16.mxu1 %v1031_v9 }
  0x2f   : > { %967 = vmatpush3.bf16.msra.mxu0 %v1031_v9  ;;  %999 = vmatpush3.bf16.msra.mxu1 %v1031_v9 }
  0x32   : > { %969 = vmatmul.mubr.bf16.vlgmr.msra.gmra.mrb[0].mxu0 %v1033_v10  ;;  %977 = vmatmul.mubr.bf16.vlgmr.msra.gmra.mrb[0].mxu1 %v1037_v11 }
  0x33   : > { %972 = vmatprep.mubr.bf16.mxu0 %v1034_v12  ;;  %980 = vmatprep.mubr.bf16.mxu1 %v1038_v13 }
  0x3a   : > { %973 = vmatmul.mubr.bf16.gmra.mrb[4].mxu0 %v1035_v14  ;;  %981 = vmatmul.mubr.bf16.gmra.mrb[4].mxu1 %v1039_v15 }
 0x105   : > { %v970_v16 = vpop.f32.mrb[0].mxu0  ;;  %v978_v17 = vpop.f32.mrb[0].mxu1 }
 0x106   : > { %v453_v18 = vpop.f32.mrb[1].mxu0  ;;  %v485_v19 = vpop.f32.mrb[1].mxu1  ;;  %v620_v31 = vmul.f32 %v970_v16, %v970_v16  ;;  %v628_v3 = vmul.f32 %v978_v17, %v978_v17 }
 0x107   : > { %v971_v20 = vpop.f32.mrb[2].mxu0  ;;  %v979_v21 = vpop.f32.mrb[2].mxu1  ;;  %v618_v22 = vmul.f32 %v453_v18, %v453_v18  ;;  %v626_v61 = vmul.f32 %v485_v19, %v485_v19 }
 0x108   : > { %v897_v23 = vpack.c.bf16 %v971_v20, %v970_v16  ;;  %v456_v24 = vpop.f32.mrb[3].mxu0  ;;  %v917_v25 = vpack.c.bf16 %v979_v21, %v978_v17  ;;  %v488_v26 = vpop.f32.mrb[3].mxu1  ;;  %v621_v34 = vmul.f32 %v971_v20, %v971_v20  ;;  %v629_v6 = vmul.f32 %v979_v21, %v979_v21 }
 0x109   : > { %v892_v27 = vpack.c.bf16 %v456_v24, %v453_v18  ;;  %v596_v28 = vadd.f32 %v456_v24, %v453_v18  ;;  %v619_v29 = vmul.f32 %v456_v24, %v456_v24  ;;  %v912_v30 = vpack.c.bf16 %v488_v26, %v485_v19 }
 0x10a   : > { %929 = vst [vmem:[%s1144_s28 + $0x8] sm:$0xff] %v897_v23   ;;  %933 = vst [vmem:[%s1144_s28 + $0x28] sm:$0xff] %v917_v25   ;;  %v627_v2 = vmul.f32 %v488_v26, %v488_v26 }
 0x10b   : > { %893 = vst [vmem:[%s1144_s28] sm:$0xff] %v892_v27   ;;  %v597_v32 = vadd.f32 %v970_v16, %v596_v28  ;;  %v634_v33 = vadd.f32 %v619_v29, %v618_v22  ;;  %932 = vst [vmem:[%s1144_s28 + $0x20] sm:$0xff] %v912_v30  }
 0x10d   : > { %v635_v35 = vadd.f32 %v634_v33, %v620_v31  ;;  %v974_v36 = vpop.f32.mrb[4].mxu0  ;;  %v598_v37 = vadd.f32 %v971_v20, %v597_v32  ;;  %v982_v38 = vpop.f32.mrb[4].mxu1 }
 0x10e   : > { %v469_v39 = vpop.f32.mrb[5].mxu0  ;;  %v501_v40 = vpop.f32.mrb[5].mxu1  ;;  %v624_v55 = vmul.f32 %v974_v36, %v974_v36  ;;  %v632_v15 = vmul.f32 %v982_v38, %v982_v38 }
 0x10f   : > { %v599_v41 = vadd.f32 %v598_v37, %v469_v39  ;;  %v622_v42 = vmul.f32 %v469_v39, %v469_v39  ;;  %v636_v43 = vadd.f32 %v635_v35, %v621_v34  ;;  %v975_v44 = vpop.f32.mrb[6].mxu0  ;;  %v983_v45 = vpop.f32.mrb[6].mxu1  ;;  %v630_v9 = vmul.f32 %v501_v40, %v501_v40 }
 0x110   : > { %v907_v46 = vpack.c.bf16 %v975_v44, %v974_v36  ;;  %v472_v47 = vpop.f32.mrb[7].mxu0  ;;  %v927_v48 = vpack.c.bf16 %v983_v45, %v982_v38  ;;  %v504_v49 = vpop.f32.mrb[7].mxu1  ;;  %v625_v58 = vmul.f32 %v975_v44, %v975_v44 }
 0x111   : > { %v637_v50 = vadd.f32 %v636_v43, %v622_v42  ;;  %v902_v51 = vpack.c.bf16 %v472_v47, %v469_v39  ;;  %v600_v52 = vadd.f32 %v599_v41, %v472_v47  ;;  %v623_v53 = vmul.f32 %v472_v47, %v472_v47 }
 0x112   : > { %931 = vst [vmem:[%s1144_s28 + $0x18] sm:$0xff] %v907_v46   ;;  %935 = vst [vmem:[%s1144_s28 + $0x38] sm:$0xff] %v927_v48   ;;  %v922_v54 = vpack.c.bf16 %v504_v49, %v501_v40  ;;  %v631_v14 = vmul.f32 %v504_v49, %v504_v49 }
 0x113   : > { %930 = vst [vmem:[%s1144_s28 + $0x10] sm:$0xff] %v902_v51   ;;  %v601_v56 = vadd.f32 %v974_v36, %v600_v52  ;;  %v638_v57 = vadd.f32 %v637_v50, %v623_v53 }
 0x114   : > { %934 = vst [vmem:[%s1144_s28 + $0x30] sm:$0xff] %v922_v54  }
 0x115   : > { %v639_v59 = vadd.f32 %v638_v57, %v624_v55  ;;  %v602_v60 = vadd.f32 %v975_v44, %v601_v56 }
 0x117   : > { %v603_v62 = vadd.f32 %v602_v60, %v485_v19  ;;  %v640_v63 = vadd.f32 %v639_v59, %v625_v58  ;;  %v633_v19 = vmul.f32 %v983_v45, %v983_v45 }
 0x119   : > { %v641_v0 = vadd.f32 %v640_v63, %v626_v61  ;;  %v604_v1 = vadd.f32 %v603_v62, %v488_v26 }
 0x11b   : > { %v605_v4 = vadd.f32 %v978_v17, %v604_v1  ;;  %v642_v5 = vadd.f32 %v641_v0, %v627_v2 }
 0x11d   : > { %v643_v7 = vadd.f32 %v642_v5, %v628_v3  ;;  %v606_v8 = vadd.f32 %v979_v21, %v605_v4 }
 0x11f   : > { %v607_v10 = vadd.f32 %v606_v8, %v501_v40  ;;  %v644_v11 = vadd.f32 %v643_v7, %v629_v6 }
 0x121   : > { %v645_v12 = vadd.f32 %v644_v11, %v630_v9  ;;  %v608_v13 = vadd.f32 %v607_v10, %v504_v49 }
 0x123   : > { %v609_v16 = vadd.f32 %v982_v38, %v608_v13  ;;  %v646_v18 = vadd.f32 %v645_v12, %v631_v14 }
 0x125   : > { %v610_v20 = vadd.f32 %v983_v45, %v609_v16  ;;  %v647_v22 = vadd.f32 %v646_v18, %v632_v15 }
 0x127   : > { %v611_v23 = vrot.slane %v610_v20, 4  ;;  %v648_v17 = vadd.f32 %v647_v22, %v633_v19 }
 0x129   : > { %v612_v24 = vadd.f32 %v611_v23, %v610_v20  ;;  %v649_v25 = vrot.slane %v648_v17, 4 }
 0x12b   : > { %v613_v26 = vrot.slane %v612_v24, 2  ;;  %v650_v21 = vadd.f32 %v649_v25, %v648_v17 }
 0x12d   : > { %v614_v27 = vadd.f32 %v613_v26, %v612_v24  ;;  %v651_v28 = vrot.slane %v650_v21, 2 }
 0x12f   : > { %v615_v29 = vrot.slane %v614_v27, 1  ;;  %v652_v30 = vadd.f32 %v651_v28, %v650_v21 }
 0x131   : > { %v616_v31 = vadd.f32 %v615_v29, %v614_v27  ;;  %v653_v32 = vrot.slane %v652_v30, 1 }
 0x133   : > { %617 = vst [vmem:[%s283_s5] sm:$0x1] %v616_v31  ;;  %v654_v33 = vadd.f32 %v653_v32, %v652_v30 }
 0x135   : > { %655 = vst [vmem:[%s289_s8] sm:$0x1] %v654_v33 }
 0x136 PF: > { %s15_s17 = sadd.s32 1, %s1062_s17   ;;  %s1176_s15 = smov %s1058_s16 }
 0x137   : > { %p12_p5 = scmp.ge.s32.totalorder %s15_s17, 6   ;;  %s1177_s16 = smov %s1179_s18 }
 0x139   :  { %14 = sbr.rel (!%p12_p5) target bundleno = 2 (0x2), region = 85 }

// kernel: generator_forward.8
= control target key start
LH: loop header
LB: loop body
LE: loop exit
PB: predicated region body
PF: predicated region fallthrough
CT: control target
= control target key end

     0   :  { %s2217_s15 = smov 0   ;;  %s2219_s16 = smov 0   ;;  %s2539_s0 = inlined_call_operand.vmem [shape: bf16[4,512,128], index: 0, kind: input, shape index: {}]   ;;  %s2540_s1 = inlined_call_operand.vmem [shape: bf16[4,128,128], index: 1, kind: input, shape index: {}]   ;;  %s2541_s2 = inlined_call_operand.vmem [shape: bf16[4,512,128], index: 2, kind: output, shape index: {0}]   ;;  %s2542_s3 = inlined_call_operand.vmem [shape: f32[4,1,1,128], index: 3, kind: output, shape index: {1}]   ;;  %s2543_s4 = inlined_call_operand.vmem [shape: f32[4,1,1,128], index: 4, kind: output, shape index: {2}]  }
   0x1   :  { %s2221_s17 = smov 0  }
   0x2 LB: > { %s27_s18 = sadd.s32 1, %s2186_s16  ;;  %p1597_p0 = scmp.ge.s32.totalorder %s2190_s17, 1  ;;  %s2190_s17 = sphi %s2221_s17, %s15_s17   ;;  %s2186_s16 = sphi %s2219_s16, %s2545_s16   ;;  %s2182_s15 = sphi %s2217_s15, %s2544_s15  }
   0x3   : > { %p29_p1 = scmp.ge.s32.totalorder %s27_s18, 4  ;;  %p202_p2 = scmp.lt.s32.totalorder %s2190_s17, 5 }
   0x5   : > { %s2547_s18 = smov (%p29_p1, %s27_s18), 0  ;;  %p203_p3 = pnand %p1597_p0, %p202_p2 }
   0x6   : > { %p254_p4 = scmp.lt.s32.totalorder (!%p203_p3), %s2182_s15, 3 }
   0x7   : > { %206 = sbr.rel (%p203_p3) target bundleno = 406 (0x196), region = 28 }
   0xe   : > { %s2549_s15 = smov (!%p254_p4, %s2182_s15), 3 }
   0xf   : > { %s1711_s19 = sshll.u32 %s2549_s15, 6  ;;  %s1710_s23 = sshll.u32 %s2549_s15, 8 }
  0x10   : > { %s2241_s22 = scalar_lea.vmem %s2540_s1, %s1711_s19  ;;  %s2252_s26 = scalar_lea.vmem %s2539_s0, %s1710_s23 }
  0x11   : > { %v2128_v0 = vld [vmem:[%s2241_s22] sm:$0xff]   ;;  %v2129_v1 = vld [vmem:[%s2241_s22 + $0x8] sm:$0xff]   ;;  %v2130_v2 = vld [vmem:[%s2241_s22 + $0x10] sm:$0xff]   ;;  %s2300_s29 = scalar_lea.vmem %s2541_s2, %s1710_s23  ;;  %s283_s6 = scalar_lea.vmem %s2542_s3, %s2549_s15 }
  0x12   : > { %2008 = vmatprep.subr.bf16.mxu0 %v2128_v0  ;;  %2088 = vmatprep.subr.bf16.mxu1 %v2128_v0  ;;  %v2131_v3 = vld [vmem:[%s2241_s22 + $0x18] sm:$0xff]   ;;  %v2136_v4 = vld [vmem:[%s2252_s26] sm:$0xff]   ;;  %v2133_v6 = vld [vmem:[%s2241_s22 + $0x28] sm:$0xff]   ;;  %s289_s9 = scalar_lea.vmem %s2543_s4, %s2549_s15 }
  0x13   : > { %2009 = vmatpush3.bf16.msra.mxu0 %v2128_v0  ;;  %2096 = vmatpush3.bf16.msra.mxu1 %v2128_v0  ;;  %v2132_v5 = vld [vmem:[%s2241_s22 + $0x20] sm:$0xff]   ;;  %v2134_v7 = vld [vmem:[%s2241_s22 + $0x30] sm:$0xff]   ;;  %v2135_v8 = vld [vmem:[%s2241_s22 + $0x38] sm:$0xff]  }
  0x14   : > { %2010 = vmatprep.subr.bf16.mxu0 %v2129_v1  ;;  %2089 = vmatprep.subr.bf16.mxu1 %v2129_v1  ;;  %v2152_v9 = vld [vmem:[%s2252_s26 + $0x80] sm:$0xff]   ;;  %v2137_v10 = vld [vmem:[%s2252_s26 + $0x8] sm:$0xff]   ;;  %v2138_v11 = vld [vmem:[%s2252_s26 + $0x10] sm:$0xff]  }
  0x15   : > { %2024 = vmatprep.mubr.bf16.mxu0 %v2136_v4  ;;  %2056 = vmatprep.mubr.bf16.mxu1 %v2152_v9  ;;  %v2153_v12 = vld [vmem:[%s2252_s26 + $0x88] sm:$0xff]   ;;  %v2154_v13 = vld [vmem:[%s2252_s26 + $0x90] sm:$0xff]   ;;  %v2139_v14 = vld [vmem:[%s2252_s26 + $0x18] sm:$0xff]  }
  0x16   : > { %v2140_v15 = vld [vmem:[%s2252_s26 + $0x20] sm:$0xff]   ;;  %v2155_v16 = vld [vmem:[%s2252_s26 + $0x98] sm:$0xff]   ;;  %v2141_v18 = vld [vmem:[%s2252_s26 + $0x28] sm:$0xff]  }
  0x17   : > { %2011 = vmatpush3.bf16.msra.mxu0 %v2129_v1  ;;  %2097 = vmatpush3.bf16.msra.mxu1 %v2129_v1  ;;  %v2156_v17 = vld [vmem:[%s2252_s26 + $0xa0] sm:$0xff]   ;;  %v2157_v19 = vld [vmem:[%s2252_s26 + $0xa8] sm:$0xff]   ;;  %v2142_v20 = vld [vmem:[%s2252_s26 + $0x30] sm:$0xff]  }
  0x18   : > { %2012 = vmatprep.subr.bf16.mxu0 %v2130_v2  ;;  %2090 = vmatprep.subr.bf16.mxu1 %v2130_v2  ;;  %v2158_v21 = vld [vmem:[%s2252_s26 + $0xb0] sm:$0xff]   ;;  %v2143_v22 = vld [vmem:[%s2252_s26 + $0x38] sm:$0xff]   ;;  %v2144_v24 = vld [vmem:[%s2252_s26 + $0x40] sm:$0xff]  }
  0x19   : > { %v2159_v23 = vld [vmem:[%s2252_s26 + $0xb8] sm:$0xff]   ;;  %v2160_v25 = vld [vmem:[%s2252_s26 + $0xc0] sm:$0xff]   ;;  %v2145_v26 = vld [vmem:[%s2252_s26 + $0x48] sm:$0xff]  }
  0x1a   : > { %v2161_v27 = vld [vmem:[%s2252_s26 + $0xc8] sm:$0xff]   ;;  %v2146_v28 = vld [vmem:[%s2252_s26 + $0x50] sm:$0xff]   ;;  %v2147_v30 = vld [vmem:[%s2252_s26 + $0x58] sm:$0xff]  }
  0x1b   : > { %2013 = vmatpush3.bf16.msra.mxu0 %v2130_v2  ;;  %2098 = vmatpush3.bf16.msra.mxu1 %v2130_v2  ;;  %v2162_v29 = vld [vmem:[%s2252_s26 + $0xd0] sm:$0xff]   ;;  %v2163_v31 = vld [vmem:[%s2252_s26 + $0xd8] sm:$0xff]   ;;  %v2148_v32 = vld [vmem:[%s2252_s26 + $0x60] sm:$0xff]  }
  0x1c   : > { %2014 = vmatprep.subr.bf16.mxu0 %v2131_v3  ;;  %2091 = vmatprep.subr.bf16.mxu1 %v2131_v3  ;;  %v2164_v33 = vld [vmem:[%s2252_s26 + $0xe0] sm:$0xff]   ;;  %v2149_v34 = vld [vmem:[%s2252_s26 + $0x68] sm:$0xff]   ;;  %v2150_v36 = vld [vmem:[%s2252_s26 + $0x70] sm:$0xff]  }
  0x1d   : > { %v2165_v35 = vld [vmem:[%s2252_s26 + $0xe8] sm:$0xff]   ;;  %v2166_v37 = vld [vmem:[%s2252_s26 + $0xf0] sm:$0xff]   ;;  %v2151_v38 = vld [vmem:[%s2252_s26 + $0x78] sm:$0xff]  }
  0x1e   : > { %v2167_v39 = vld [vmem:[%s2252_s26 + $0xf8] sm:$0xff]  }
  0x1f   : > { %2015 = vmatpush3.bf16.msra.mxu0 %v2131_v3  ;;  %2099 = vmatpush3.bf16.msra.mxu1 %v2131_v3 }
  0x20   : > { %2016 = vmatprep.subr.bf16.mxu0 %v2132_v5  ;;  %2092 = vmatprep.subr.bf16.mxu1 %v2132_v5 }
  0x23   : > { %2017 = vmatpush3.bf16.msra.mxu0 %v2132_v5  ;;  %2100 = vmatpush3.bf16.msra.mxu1 %v2132_v5 }
  0x24   : > { %2018 = vmatprep.subr.bf16.mxu0 %v2133_v6  ;;  %2093 = vmatprep.subr.bf16.mxu1 %v2133_v6 }
  0x27   : > { %2019 = vmatpush3.bf16.msra.mxu0 %v2133_v6  ;;  %2101 = vmatpush3.bf16.msra.mxu1 %v2133_v6 }
  0x28   : > { %2020 = vmatprep.subr.bf16.mxu0 %v2134_v7  ;;  %2094 = vmatprep.subr.bf16.mxu1 %v2134_v7 }
  0x2b   : > { %2021 = vmatpush3.bf16.msra.mxu0 %v2134_v7  ;;  %2102 = vmatpush3.bf16.msra.mxu1 %v2134_v7 }
  0x2c   : > { %2022 = vmatprep.subr.bf16.mxu0 %v2135_v8  ;;  %2095 = vmatprep.subr.bf16.mxu1 %v2135_v8 }
  0x2f   : > { %2023 = vmatpush3.bf16.msra.mxu0 %v2135_v8  ;;  %2103 = vmatpush3.bf16.msra.mxu1 %v2135_v8 }
  0x32   : > { %2025 = vmatmul.mubr.bf16.vlgmr.msra.gmra.mrb[0].mxu0 %v2137_v10  ;;  %2057 = vmatmul.mubr.bf16.vlgmr.msra.gmra.mrb[0].mxu1 %v2153_v12 }
  0x33   : > { %2028 = vmatprep.mubr.bf16.mxu0 %v2138_v11  ;;  %2060 = vmatprep.mubr.bf16.mxu1 %v2154_v13 }
  0x3a   : > { %2029 = vmatmul.mubr.bf16.gmra.mrb[4].mxu0 %v2139_v14  ;;  %2061 = vmatmul.mubr.bf16.gmra.mrb[4].mxu1 %v2155_v16 }
  0x3b   : > { %2032 = vmatprep.mubr.bf16.mxu0 %v2140_v15  ;;  %2064 = vmatprep.mubr.bf16.mxu1 %v2156_v17 }
  0x42   : > { %2033 = vmatmul.mubr.bf16.gmra.mrb[8].mxu0 %v2141_v18  ;;  %2065 = vmatmul.mubr.bf16.gmra.mrb[8].mxu1 %v2157_v19 }
  0x43   : > { %2036 = vmatprep.mubr.bf16.mxu0 %v2142_v20  ;;  %2068 = vmatprep.mubr.bf16.mxu1 %v2158_v21 }
  0x4a   : > { %2037 = vmatmul.mubr.bf16.gmra.mrb[12].mxu0 %v2143_v22  ;;  %2069 = vmatmul.mubr.bf16.gmra.mrb[12].mxu1 %v2159_v23 }
  0x4b   : > { %2040 = vmatprep.mubr.bf16.mxu0 %v2144_v24  ;;  %2072 = vmatprep.mubr.bf16.mxu1 %v2160_v25 }
  0x52   : > { %2041 = vmatmul.mubr.bf16.gmra.mrb[16].mxu0 %v2145_v26  ;;  %2073 = vmatmul.mubr.bf16.gmra.mrb[16].mxu1 %v2161_v27 }
  0x53   : > { %2044 = vmatprep.mubr.bf16.mxu0 %v2146_v28  ;;  %2076 = vmatprep.mubr.bf16.mxu1 %v2162_v29 }
  0x5a   : > { %2045 = vmatmul.mubr.bf16.gmra.mrb[20].mxu0 %v2147_v30  ;;  %2077 = vmatmul.mubr.bf16.gmra.mrb[20].mxu1 %v2163_v31 }
  0x5b   : > { %2048 = vmatprep.mubr.bf16.mxu0 %v2148_v32  ;;  %2080 = vmatprep.mubr.bf16.mxu1 %v2164_v33 }
  0x62   : > { %2049 = vmatmul.mubr.bf16.gmra.mrb[24].mxu0 %v2149_v34  ;;  %2081 = vmatmul.mubr.bf16.gmra.mrb[24].mxu1 %v2165_v35 }
  0x63   : > { %2052 = vmatprep.mubr.bf16.mxu0 %v2150_v36  ;;  %2084 = vmatprep.mubr.bf16.mxu1 %v2166_v37 }
  0x6a   : > { %2053 = vmatmul.mubr.bf16.gmra.mrb[28].mxu0 %v2151_v38  ;;  %2085 = vmatmul.mubr.bf16.gmra.mrb[28].mxu1 %v2167_v39 }
 0x105   : > { %v2026_v40 = vpop.f32.mrb[0].mxu0  ;;  %v2291_v41 = vpop.f32.mrb[0].mxu1 }
 0x106   : > { %v645_v42 = vpop.f32.mrb[1].mxu0  ;;  %v2293_v43 = vpop.f32.mrb[1].mxu1  ;;  %v1292_v55 = vmul.f32 %v2026_v40, %v2026_v40 }
 0x107   : > { %v2027_v44 = vpop.f32.mrb[2].mxu0  ;;  %v2302_v45 = vpop.f32.mrb[2].mxu1  ;;  %v1290_v46 = vmul.f32 %v645_v42, %v645_v42 }
 0x108   : > { %v1785_v47 = vpack.c.bf16 %v2027_v44, %v2026_v40  ;;  %v648_v48 = vpop.f32.mrb[3].mxu0  ;;  %v1865_v49 = vpack.c.bf16 %v2302_v45, %v2291_v41  ;;  %v2306_v50 = vpop.f32.mrb[3].mxu1  ;;  %v1293_v58 = vmul.f32 %v2027_v44, %v2027_v44 }
 0x109   : > { %v1780_v51 = vpack.c.bf16 %v648_v48, %v645_v42  ;;  %v1220_v52 = vadd.f32 %v648_v48, %v645_v42  ;;  %v1291_v53 = vmul.f32 %v648_v48, %v648_v48  ;;  %v1860_v54 = vpack.c.bf16 %v2306_v50, %v2293_v43 }
 0x10a   : > { %1937 = vst [vmem:[%s2300_s29 + $0x8] sm:$0xff] %v1785_v47   ;;  %1953 = vst [vmem:[%s2300_s29 + $0x88] sm:$0xff] %v1865_v49  }
 0x10b   : > { %1781 = vst [vmem:[%s2300_s29] sm:$0xff] %v1780_v51   ;;  %v1221_v56 = vadd.f32 %v2026_v40, %v1220_v52  ;;  %v1354_v57 = vadd.f32 %v1291_v53, %v1290_v46  ;;  %1952 = vst [vmem:[%s2300_s29 + $0x80] sm:$0xff] %v1860_v54  }
 0x10d   : > { %v1355_v59 = vadd.f32 %v1354_v57, %v1292_v55  ;;  %v2030_v60 = vpop.f32.mrb[4].mxu0  ;;  %v1222_v61 = vadd.f32 %v2027_v44, %v1221_v56  ;;  %v2314_v62 = vpop.f32.mrb[4].mxu1 }
 0x10e   : > { %v661_v63 = vpop.f32.mrb[5].mxu0  ;;  %v2316_v0 = vpop.f32.mrb[5].mxu1  ;;  %v1296_v15 = vmul.f32 %v2030_v60, %v2030_v60 }
 0x10f   : > { %v1223_v1 = vadd.f32 %v1222_v61, %v661_v63  ;;  %v1294_v2 = vmul.f32 %v661_v63, %v661_v63  ;;  %v1356_v3 = vadd.f32 %v1355_v59, %v1293_v58  ;;  %v2031_v4 = vpop.f32.mrb[6].mxu0  ;;  %v2318_v5 = vpop.f32.mrb[6].mxu1 }
 0x110   : > { %v1795_v6 = vpack.c.bf16 %v2031_v4, %v2030_v60  ;;  %v664_v7 = vpop.f32.mrb[7].mxu0  ;;  %v1875_v8 = vpack.c.bf16 %v2318_v5, %v2314_v62  ;;  %v2322_v9 = vpop.f32.mrb[7].mxu1  ;;  %v1297_v18 = vmul.f32 %v2031_v4, %v2031_v4 }
 0x111   : > { %v1357_v10 = vadd.f32 %v1356_v3, %v1294_v2  ;;  %v1790_v11 = vpack.c.bf16 %v664_v7, %v661_v63  ;;  %v1224_v12 = vadd.f32 %v1223_v1, %v664_v7  ;;  %v1295_v13 = vmul.f32 %v664_v7, %v664_v7 }
 0x112   : > { %1939 = vst [vmem:[%s2300_s29 + $0x18] sm:$0xff] %v1795_v6   ;;  %1955 = vst [vmem:[%s2300_s29 + $0x98] sm:$0xff] %v1875_v8   ;;  %v1870_v14 = vpack.c.bf16 %v2322_v9, %v2316_v0 }
 0x113   : > { %1938 = vst [vmem:[%s2300_s29 + $0x10] sm:$0xff] %v1790_v11   ;;  %v1225_v16 = vadd.f32 %v2030_v60, %v1224_v12  ;;  %v1358_v17 = vadd.f32 %v1357_v10, %v1295_v13 }
 0x114   : > { %1954 = vst [vmem:[%s2300_s29 + $0x90] sm:$0xff] %v1870_v14  }
 0x115   : > { %v1359_v19 = vadd.f32 %v1358_v17, %v1296_v15  ;;  %v2034_v20 = vpop.f32.mrb[8].mxu0  ;;  %v1226_v21 = vadd.f32 %v2031_v4, %v1225_v16  ;;  %v2330_v22 = vpop.f32.mrb[8].mxu1 }
 0x116   : > { %v677_v23 = vpop.f32.mrb[9].mxu0  ;;  %v2332_v24 = vpop.f32.mrb[9].mxu1  ;;  %v1300_v39 = vmul.f32 %v2034_v20, %v2034_v20 }
 0x117   : > { %v1227_v25 = vadd.f32 %v1226_v21, %v677_v23  ;;  %v1298_v26 = vmul.f32 %v677_v23, %v677_v23  ;;  %v1360_v27 = vadd.f32 %v1359_v19, %v1297_v18  ;;  %v2035_v28 = vpop.f32.mrb[10].mxu0  ;;  %v2334_v29 = vpop.f32.mrb[10].mxu1 }
 0x118   : > { %v1805_v30 = vpack.c.bf16 %v2035_v28, %v2034_v20  ;;  %v680_v31 = vpop.f32.mrb[11].mxu0  ;;  %v1885_v32 = vpack.c.bf16 %v2334_v29, %v2330_v22  ;;  %v2338_v33 = vpop.f32.mrb[11].mxu1  ;;  %v1301_v44 = vmul.f32 %v2035_v28, %v2035_v28 }
 0x119   : > { %v1361_v34 = vadd.f32 %v1360_v27, %v1298_v26  ;;  %v1800_v35 = vpack.c.bf16 %v680_v31, %v677_v23  ;;  %v1228_v36 = vadd.f32 %v1227_v25, %v680_v31  ;;  %v1299_v37 = vmul.f32 %v680_v31, %v680_v31 }
 0x11a   : > { %1941 = vst [vmem:[%s2300_s29 + $0x28] sm:$0xff] %v1805_v30   ;;  %1957 = vst [vmem:[%s2300_s29 + $0xa8] sm:$0xff] %v1885_v32   ;;  %v1880_v38 = vpack.c.bf16 %v2338_v33, %v2332_v24 }
 0x11b   : > { %1940 = vst [vmem:[%s2300_s29 + $0x20] sm:$0xff] %v1800_v35   ;;  %v1229_v40 = vadd.f32 %v2034_v20, %v1228_v36  ;;  %v1362_v42 = vadd.f32 %v1361_v34, %v1299_v37 }
 0x11c   : > { %1956 = vst [vmem:[%s2300_s29 + $0xa0] sm:$0xff] %v1880_v38  }
 0x11d   : > { %v1363_v46 = vadd.f32 %v1362_v42, %v1300_v39  ;;  %v2038_v47 = vpop.f32.mrb[12].mxu0  ;;  %v1230_v48 = vadd.f32 %v2035_v28, %v1229_v40  ;;  %v2346_v49 = vpop.f32.mrb[12].mxu1 }
 0x11e   : > { %v693_v51 = vpop.f32.mrb[13].mxu0  ;;  %v2348_v52 = vpop.f32.mrb[13].mxu1  ;;  %v1304_v6 = vmul.f32 %v2038_v47, %v2038_v47 }
 0x11f   : > { %v1231_v53 = vadd.f32 %v1230_v48, %v693_v51  ;;  %v1302_v54 = vmul.f32 %v693_v51, %v693_v51  ;;  %v1364_v55 = vadd.f32 %v1363_v46, %v1301_v44  ;;  %v2039_v56 = vpop.f32.mrb[14].mxu0  ;;  %v2350_v57 = vpop.f32.mrb[14].mxu1 }
 0x120   : > { %v1815_v58 = vpack.c.bf16 %v2039_v56, %v2038_v47  ;;  %v696_v59 = vpop.f32.mrb[15].mxu0  ;;  %v1895_v60 = vpack.c.bf16 %v2350_v57, %v2346_v49  ;;  %v2354_v61 = vpop.f32.mrb[15].mxu1  ;;  %v1305_v10 = vmul.f32 %v2039_v56, %v2039_v56 }
 0x121   : > { %v1365_v63 = vadd.f32 %v1364_v55, %v1302_v54  ;;  %v1810_v1 = vpack.c.bf16 %v696_v59, %v693_v51  ;;  %v1232_v2 = vadd.f32 %v1231_v53, %v696_v59  ;;  %v1303_v3 = vmul.f32 %v696_v59, %v696_v59 }
 0x122   : > { %1943 = vst [vmem:[%s2300_s29 + $0x38] sm:$0xff] %v1815_v58   ;;  %1959 = vst [vmem:[%s2300_s29 + $0xb8] sm:$0xff] %v1895_v60   ;;  %v1890_v4 = vpack.c.bf16 %v2354_v61, %v2348_v52 }
 0x123   : > { %1942 = vst [vmem:[%s2300_s29 + $0x30] sm:$0xff] %v1810_v1   ;;  %v1233_v7 = vadd.f32 %v2038_v47, %v1232_v2  ;;  %v1366_v8 = vadd.f32 %v1365_v63, %v1303_v3 }
 0x124   : > { %1958 = vst [vmem:[%s2300_s29 + $0xb0] sm:$0xff] %v1890_v4  }
 0x125   : > { %v1367_v11 = vadd.f32 %v1366_v8, %v1304_v6  ;;  %v2042_v12 = vpop.f32.mrb[16].mxu0  ;;  %v1234_v13 = vadd.f32 %v2039_v56, %v1233_v7  ;;  %v2362_v14 = vpop.f32.mrb[16].mxu1 }
 0x126   : > { %v709_v15 = vpop.f32.mrb[17].mxu0  ;;  %v2364_v16 = vpop.f32.mrb[17].mxu1  ;;  %v1308_v35 = vmul.f32 %v2042_v12, %v2042_v12 }
 0x127   : > { %v1235_v17 = vadd.f32 %v1234_v13, %v709_v15  ;;  %v1306_v18 = vmul.f32 %v709_v15, %v709_v15  ;;  %v1368_v19 = vadd.f32 %v1367_v11, %v1305_v10  ;;  %v2043_v20 = vpop.f32.mrb[18].mxu0  ;;  %v2366_v21 = vpop.f32.mrb[18].mxu1 }
 0x128   : > { %v1825_v23 = vpack.c.bf16 %v2043_v20, %v2042_v12  ;;  %v712_v25 = vpop.f32.mrb[19].mxu0  ;;  %v1905_v26 = vpack.c.bf16 %v2366_v21, %v2362_v14  ;;  %v2370_v27 = vpop.f32.mrb[19].mxu1  ;;  %v1309_v38 = vmul.f32 %v2043_v20, %v2043_v20 }
 0x129   : > { %v1369_v28 = vadd.f32 %v1368_v19, %v1306_v18  ;;  %v1820_v30 = vpack.c.bf16 %v712_v25, %v709_v15  ;;  %v1236_v31 = vadd.f32 %v1235_v17, %v712_v25  ;;  %v1307_v32 = vmul.f32 %v712_v25, %v712_v25 }
 0x12a   : > { %1945 = vst [vmem:[%s2300_s29 + $0x48] sm:$0xff] %v1825_v23   ;;  %1961 = vst [vmem:[%s2300_s29 + $0xc8] sm:$0xff] %v1905_v26   ;;  %v1900_v34 = vpack.c.bf16 %v2370_v27, %v2364_v16 }
 0x12b   : > { %1944 = vst [vmem:[%s2300_s29 + $0x40] sm:$0xff] %v1820_v30   ;;  %v1237_v36 = vadd.f32 %v2042_v12, %v1236_v31  ;;  %v1370_v37 = vadd.f32 %v1369_v28, %v1307_v32 }
 0x12c   : > { %1960 = vst [vmem:[%s2300_s29 + $0xc0] sm:$0xff] %v1900_v34  }
 0x12d   : > { %v1371_v39 = vadd.f32 %v1370_v37, %v1308_v35  ;;  %v2046_v40 = vpop.f32.mrb[20].mxu0  ;;  %v1238_v42 = vadd.f32 %v2043_v20, %v1237_v36  ;;  %v2378_v44 = vpop.f32.mrb[20].mxu1 }
 0x12e   : > { %v725_v46 = vpop.f32.mrb[21].mxu0  ;;  %v2380_v47 = vpop.f32.mrb[21].mxu1  ;;  %v1312_v6 = vmul.f32 %v2046_v40, %v2046_v40 }
 0x12f   : > { %v1239_v48 = vadd.f32 %v1238_v42, %v725_v46  ;;  %v1310_v51 = vmul.f32 %v725_v46, %v725_v46  ;;  %v1372_v53 = vadd.f32 %v1371_v39, %v1309_v38  ;;  %v2047_v54 = vpop.f32.mrb[22].mxu0  ;;  %v2382_v55 = vpop.f32.mrb[22].mxu1 }
 0x130   : > { %v1835_v56 = vpack.c.bf16 %v2047_v54, %v2046_v40  ;;  %v728_v58 = vpop.f32.mrb[23].mxu0  ;;  %v1915_v59 = vpack.c.bf16 %v2382_v55, %v2378_v44  ;;  %v2386_v60 = vpop.f32.mrb[23].mxu1  ;;  %v1313_v10 = vmul.f32 %v2047_v54, %v2047_v54 }
 0x131   : > { %v1373_v63 = vadd.f32 %v1372_v53, %v1310_v51  ;;  %v1830_v1 = vpack.c.bf16 %v728_v58, %v725_v46  ;;  %v1240_v2 = vadd.f32 %v1239_v48, %v728_v58  ;;  %v1311_v3 = vmul.f32 %v728_v58, %v728_v58 }
 0x132   : > { %1947 = vst [vmem:[%s2300_s29 + $0x58] sm:$0xff] %v1835_v56   ;;  %1963 = vst [vmem:[%s2300_s29 + $0xd8] sm:$0xff] %v1915_v59   ;;  %v1910_v4 = vpack.c.bf16 %v2386_v60, %v2380_v47 }
 0x133   : > { %1946 = vst [vmem:[%s2300_s29 + $0x50] sm:$0xff] %v1830_v1   ;;  %v1241_v7 = vadd.f32 %v2046_v40, %v1240_v2  ;;  %v1374_v8 = vadd.f32 %v1373_v63, %v1311_v3 }
 0x134   : > { %1962 = vst [vmem:[%s2300_s29 + $0xd0] sm:$0xff] %v1910_v4  }
 0x135   : > { %v1375_v11 = vadd.f32 %v1374_v8, %v1312_v6  ;;  %v2050_v12 = vpop.f32.mrb[24].mxu0  ;;  %v1242_v13 = vadd.f32 %v2047_v54, %v1241_v7  ;;  %v2394_v15 = vpop.f32.mrb[24].mxu1 }
 0x136   : > { %v741_v17 = vpop.f32.mrb[25].mxu0  ;;  %v2396_v18 = vpop.f32.mrb[25].mxu1  ;;  %v1316_v39 = vmul.f32 %v2050_v12, %v2050_v12 }
 0x137   : > { %v1243_v19 = vadd.f32 %v1242_v13, %v741_v17  ;;  %v1314_v20 = vmul.f32 %v741_v17, %v741_v17  ;;  %v1376_v23 = vadd.f32 %v1375_v11, %v1313_v10  ;;  %v2051_v25 = vpop.f32.mrb[26].mxu0  ;;  %v2398_v26 = vpop.f32.mrb[26].mxu1 }
 0x138   : > { %v1845_v28 = vpack.c.bf16 %v2051_v25, %v2050_v12  ;;  %v744_v30 = vpop.f32.mrb[27].mxu0  ;;  %v1925_v31 = vpack.c.bf16 %v2398_v26, %v2394_v15  ;;  %v2402_v32 = vpop.f32.mrb[27].mxu1  ;;  %v1317_v46 = vmul.f32 %v2051_v25, %v2051_v25 }
 0x139   : > { %v1377_v34 = vadd.f32 %v1376_v23, %v1314_v20  ;;  %v1840_v35 = vpack.c.bf16 %v744_v30, %v741_v17  ;;  %v1244_v36 = vadd.f32 %v1243_v19, %v744_v30  ;;  %v1315_v37 = vmul.f32 %v744_v30, %v744_v30 }
 0x13a   : > { %1949 = vst [vmem:[%s2300_s29 + $0x68] sm:$0xff] %v1845_v28   ;;  %1965 = vst [vmem:[%s2300_s29 + $0xe8] sm:$0xff] %v1925_v31   ;;  %v1920_v38 = vpack.c.bf16 %v2402_v32, %v2396_v18  ;;  %v1322_v31 = vmul.f32 %v2293_v43, %v2293_v43 }
 0x13b   : > { %1948 = vst [vmem:[%s2300_s29 + $0x60] sm:$0xff] %v1840_v35   ;;  %v1245_v40 = vadd.f32 %v2050_v12, %v1244_v36  ;;  %v1378_v42 = vadd.f32 %v1377_v34, %v1315_v37 }
 0x13c   : > { %1964 = vst [vmem:[%s2300_s29 + $0xe0] sm:$0xff] %v1920_v38   ;;  %v1323_v38 = vmul.f32 %v2306_v50, %v2306_v50 }
 0x13d   : > { %v1379_v48 = vadd.f32 %v1378_v42, %v1316_v39  ;;  %v2054_v51 = vpop.f32.mrb[28].mxu0  ;;  %v1246_v53 = vadd.f32 %v2051_v25, %v1245_v40  ;;  %v2410_v54 = vpop.f32.mrb[28].mxu1  ;;  %v1324_v39 = vmul.f32 %v2291_v41, %v2291_v41 }
 0x13e   : > { %v757_v56 = vpop.f32.mrb[29].mxu0  ;;  %v2412_v58 = vpop.f32.mrb[29].mxu1  ;;  %v1320_v19 = vmul.f32 %v2054_v51, %v2054_v51 }
 0x13f   : > { %v1247_v59 = vadd.f32 %v1246_v53, %v757_v56  ;;  %v1318_v63 = vmul.f32 %v757_v56, %v757_v56  ;;  %v1380_v1 = vadd.f32 %v1379_v48, %v1317_v46  ;;  %v2055_v2 = vpop.f32.mrb[30].mxu0  ;;  %v2414_v3 = vpop.f32.mrb[30].mxu1  ;;  %v1325_v46 = vmul.f32 %v2302_v45, %v2302_v45 }
 0x140   : > { %v1855_v4 = vpack.c.bf16 %v2055_v2, %v2054_v51  ;;  %v760_v6 = vpop.f32.mrb[31].mxu0  ;;  %v1935_v7 = vpack.c.bf16 %v2414_v3, %v2410_v54  ;;  %v2418_v8 = vpop.f32.mrb[31].mxu1  ;;  %v1321_v25 = vmul.f32 %v2055_v2, %v2055_v2 }
 0x141   : > { %v1381_v10 = vadd.f32 %v1380_v1, %v1318_v63  ;;  %v1850_v11 = vpack.c.bf16 %v760_v6, %v757_v56  ;;  %v1248_v12 = vadd.f32 %v1247_v59, %v760_v6  ;;  %v1319_v13 = vmul.f32 %v760_v6, %v760_v6 }
 0x142   : > { %1951 = vst [vmem:[%s2300_s29 + $0x78] sm:$0xff] %v1855_v4   ;;  %1967 = vst [vmem:[%s2300_s29 + $0xf8] sm:$0xff] %v1935_v7   ;;  %v1930_v17 = vpack.c.bf16 %v2418_v8, %v2412_v58  ;;  %v1327_v63 = vmul.f32 %v2322_v9, %v2322_v9 }
 0x143   : > { %1950 = vst [vmem:[%s2300_s29 + $0x70] sm:$0xff] %v1850_v11   ;;  %v1249_v20 = vadd.f32 %v2054_v51, %v1248_v12  ;;  %v1382_v23 = vadd.f32 %v1381_v10, %v1319_v13  ;;  %v1331_v12 = vmul.f32 %v2338_v33, %v2338_v33 }
 0x144   : > { %1966 = vst [vmem:[%s2300_s29 + $0xf0] sm:$0xff] %v1930_v17  }
 0x145   : > { %v1383_v28 = vadd.f32 %v1382_v23, %v1320_v19  ;;  %v1250_v30 = vadd.f32 %v2055_v2, %v1249_v20 }
 0x147   : > { %v1251_v34 = vadd.f32 %v1250_v30, %v2293_v43  ;;  %v1384_v35 = vadd.f32 %v1383_v28, %v1321_v25  ;;  %v1326_v43 = vmul.f32 %v2316_v0, %v2316_v0  ;;  %v1335_v30 = vmul.f32 %v2354_v61, %v2354_v61 }
 0x149   : > { %v1385_v36 = vadd.f32 %v1384_v35, %v1322_v31  ;;  %v1252_v37 = vadd.f32 %v1251_v34, %v2306_v50 }
 0x14b   : > { %v1253_v40 = vadd.f32 %v2291_v41, %v1252_v37  ;;  %v1386_v42 = vadd.f32 %v1385_v36, %v1323_v38  ;;  %v1328_v41 = vmul.f32 %v2314_v62, %v2314_v62 }
 0x14d   : > { %v1387_v48 = vadd.f32 %v1386_v42, %v1324_v39  ;;  %v1254_v51 = vadd.f32 %v2302_v45, %v1253_v40  ;;  %v1329_v45 = vmul.f32 %v2318_v5, %v2318_v5  ;;  %v1339_v40 = vmul.f32 %v2370_v27, %v2370_v27 }
 0x14f   : > { %v1255_v53 = vadd.f32 %v1254_v51, %v2316_v0  ;;  %v1388_v56 = vadd.f32 %v1387_v48, %v1325_v46  ;;  %v1330_v0 = vmul.f32 %v2332_v24, %v2332_v24 }
 0x151   : > { %v1389_v59 = vadd.f32 %v1388_v56, %v1326_v43  ;;  %v1256_v50 = vadd.f32 %v1255_v53, %v2322_v9 }
 0x153   : > { %v1257_v1 = vadd.f32 %v2314_v62, %v1256_v50  ;;  %v1390_v2 = vadd.f32 %v1389_v59, %v1327_v63  ;;  %v1332_v62 = vmul.f32 %v2330_v22, %v2330_v22  ;;  %v1343_v59 = vmul.f32 %v2386_v60, %v2386_v60 }
 0x155   : > { %v1391_v4 = vadd.f32 %v1390_v2, %v1328_v41  ;;  %v1258_v6 = vadd.f32 %v2318_v5, %v1257_v1  ;;  %v1333_v5 = vmul.f32 %v2334_v29, %v2334_v29 }
 0x157   : > { %v1259_v7 = vadd.f32 %v1258_v6, %v2332_v24  ;;  %v1392_v10 = vadd.f32 %v1391_v4, %v1329_v45  ;;  %v1334_v24 = vmul.f32 %v2348_v52, %v2348_v52  ;;  %v1347_v6 = vmul.f32 %v2402_v32, %v2402_v32 }
 0x159   : > { %v1393_v11 = vadd.f32 %v1392_v10, %v1330_v0  ;;  %v1260_v9 = vadd.f32 %v1259_v7, %v2338_v33 }
 0x15b   : > { %v1261_v13 = vadd.f32 %v2330_v22, %v1260_v9  ;;  %v1394_v17 = vadd.f32 %v1393_v11, %v1331_v12  ;;  %v1336_v22 = vmul.f32 %v2346_v49, %v2346_v49 }
 0x15d   : > { %v1395_v19 = vadd.f32 %v1394_v17, %v1332_v62  ;;  %v1262_v20 = vadd.f32 %v2334_v29, %v1261_v13  ;;  %v1337_v29 = vmul.f32 %v2350_v57, %v2350_v57  ;;  %v1351_v13 = vmul.f32 %v2418_v8, %v2418_v8 }
 0x15f   : > { %v1263_v23 = vadd.f32 %v1262_v20, %v2348_v52  ;;  %v1396_v25 = vadd.f32 %v1395_v19, %v1333_v5  ;;  %v1338_v52 = vmul.f32 %v2364_v16, %v2364_v16 }
 0x161   : > { %v1397_v28 = vadd.f32 %v1396_v25, %v1334_v24  ;;  %v1264_v33 = vadd.f32 %v1263_v23, %v2354_v61 }
 0x163   : > { %v1265_v31 = vadd.f32 %v2346_v49, %v1264_v33  ;;  %v1398_v34 = vadd.f32 %v1397_v28, %v1335_v30  ;;  %v1340_v49 = vmul.f32 %v2362_v14, %v2362_v14 }
 0x165   : > { %v1399_v35 = vadd.f32 %v1398_v34, %v1336_v22  ;;  %v1266_v36 = vadd.f32 %v2350_v57, %v1265_v31  ;;  %v1341_v57 = vmul.f32 %v2366_v21, %v2366_v21 }
 0x167   : > { %v1267_v37 = vadd.f32 %v1266_v36, %v2364_v16  ;;  %v1400_v38 = vadd.f32 %v1399_v35, %v1337_v29  ;;  %v1342_v16 = vmul.f32 %v2380_v47, %v2380_v47 }
 0x169   : > { %v1401_v39 = vadd.f32 %v1400_v38, %v1338_v52  ;;  %v1268_v61 = vadd.f32 %v1267_v37, %v2370_v27 }
 0x16b   : > { %v1269_v42 = vadd.f32 %v2362_v14, %v1268_v61  ;;  %v1402_v46 = vadd.f32 %v1401_v39, %v1339_v40  ;;  %v1344_v14 = vmul.f32 %v2378_v44, %v2378_v44 }
 0x16d   : > { %v1403_v48 = vadd.f32 %v1402_v46, %v1340_v49  ;;  %v1270_v51 = vadd.f32 %v2366_v21, %v1269_v42  ;;  %v1345_v21 = vmul.f32 %v2382_v55, %v2382_v55 }
 0x16f   : > { %v1271_v43 = vadd.f32 %v1270_v51, %v2380_v47  ;;  %v1404_v53 = vadd.f32 %v1403_v48, %v1341_v57  ;;  %v1346_v47 = vmul.f32 %v2396_v18, %v2396_v18 }
 0x171   : > { %v1405_v56 = vadd.f32 %v1404_v53, %v1342_v16  ;;  %v1272_v27 = vadd.f32 %v1271_v43, %v2386_v60 }
 0x173   : > { %v1273_v50 = vadd.f32 %v2378_v44, %v1272_v27  ;;  %v1406_v63 = vadd.f32 %v1405_v56, %v1343_v59  ;;  %v1348_v44 = vmul.f32 %v2394_v15, %v2394_v15 }
 0x175   : > { %v1407_v41 = vadd.f32 %v1406_v63, %v1344_v14  ;;  %v1274_v1 = vadd.f32 %v2382_v55, %v1273_v50  ;;  %v1349_v55 = vmul.f32 %v2398_v26, %v2398_v26 }
 0x177   : > { %v1275_v2 = vadd.f32 %v1274_v1, %v2396_v18  ;;  %v1408_v45 = vadd.f32 %v1407_v41, %v1345_v21  ;;  %v1350_v18 = vmul.f32 %v2412_v58, %v2412_v58 }
 0x179   : > { %v1409_v4 = vadd.f32 %v1408_v45, %v1346_v47  ;;  %v1276_v60 = vadd.f32 %v1275_v2, %v2402_v32 }
 0x17b   : > { %v1277_v0 = vadd.f32 %v2394_v15, %v1276_v60  ;;  %v1410_v7 = vadd.f32 %v1409_v4, %v1347_v6  ;;  %v1352_v15 = vmul.f32 %v2410_v54, %v2410_v54 }
 0x17d   : > { %v1411_v10 = vadd.f32 %v1410_v7, %v1348_v44  ;;  %v1278_v11 = vadd.f32 %v2398_v26, %v1277_v0  ;;  %v1353_v26 = vmul.f32 %v2414_v3, %v2414_v3 }
 0x17f   : > { %v1279_v9 = vadd.f32 %v1278_v11, %v2412_v58  ;;  %v1412_v12 = vadd.f32 %v1411_v10, %v1349_v55 }
 0x181   : > { %v1413_v62 = vadd.f32 %v1412_v12, %v1350_v18  ;;  %v1280_v32 = vadd.f32 %v1279_v9, %v2418_v8 }
 0x183   : > { %v1281_v17 = vadd.f32 %v2410_v54, %v1280_v32  ;;  %v1414_v5 = vadd.f32 %v1413_v62, %v1351_v13 }
 0x185   : > { %v1282_v58 = vadd.f32 %v2414_v3, %v1281_v17  ;;  %v1415_v19 = vadd.f32 %v1414_v5, %v1352_v15 }
 0x187   : > { %v1283_v20 = vrot.slane %v1282_v58, 4  ;;  %v1416_v24 = vadd.f32 %v1415_v19, %v1353_v26 }
 0x189   : > { %v1284_v23 = vadd.f32 %v1283_v20, %v1282_v58  ;;  %v1417_v25 = vrot.slane %v1416_v24, 4 }
 0x18b   : > { %v1285_v28 = vrot.slane %v1284_v23, 2  ;;  %v1418_v8 = vadd.f32 %v1417_v25, %v1416_v24 }
 0x18d   : > { %v1286_v33 = vadd.f32 %v1285_v28, %v1284_v23  ;;  %v1419_v30 = vrot.slane %v1418_v8, 2 }
 0x18f   : > { %v1287_v22 = vrot.slane %v1286_v33, 1  ;;  %v1420_v31 = vadd.f32 %v1419_v30, %v1418_v8 }
 0x191   : > { %v1288_v54 = vadd.f32 %v1287_v22, %v1286_v33  ;;  %v1421_v34 = vrot.slane %v1420_v31, 1 }
 0x193   : > { %1289 = vst [vmem:[%s283_s6] sm:$0x1] %v1288_v54  ;;  %v1422_v3 = vadd.f32 %v1421_v34, %v1420_v31 }
 0x195   : > { %1423 = vst [vmem:[%s289_s9] sm:$0x1] %v1422_v3 }
 0x196 PF: > { %s15_s17 = sadd.s32 1, %s2190_s17   ;;  %s2544_s15 = smov %s2186_s16 }
 0x197   : > { %p12_p5 = scmp.ge.s32.totalorder %s15_s17, 6   ;;  %s2545_s16 = smov %s2547_s18 }
 0x199   :  { %14 = sbr.rel (!%p12_p5) target bundleno = 2 (0x2), region = 85 }

// kernel: generator_forward.9
= control target key start
LH: loop header
LB: loop body
LE: loop exit
PB: predicated region body
PF: predicated region fallthrough
CT: control target
= control target key end

     0   :  { %s965_s9 = smov 0   ;;  %s967_s10 = smov 0   ;;  %s1102_s0 = inlined_call_operand.vmem [shape: bf16[4,16,128], index: 0, kind: input, shape index: {}]   ;;  %s1103_s1 = inlined_call_operand.vmem [shape: bf16[4,2048,128], index: 1, kind: input, shape index: {}]   ;;  %s1104_s2 = inlined_call_operand.vmem [shape: bf16[4,16,2048], index: 2, kind: output, shape index: {}]  }
   0x1   :  { %s969_s11 = smov 0   ;;  %s971_s12 = smov 0  }
   0x2   :  { %s973_s13 = smov 0   ;;  %s975_s14 = smov 0  }
   0x3   :  { %s977_s15 = smov 0  }
   0x4 LB: > { %s21_s16 = sadd.s32 1, %s940_s13  ;;  %s24_s17 = sadd.s32 1, %s944_s14  ;;  %s948_s15 = sphi %s977_s15, %s12_s15   ;;  %s944_s14 = sphi %s975_s14, %s1111_s14   ;;  %s940_s13 = sphi %s973_s13, %s1110_s13   ;;  %s936_s12 = sphi %s971_s12, %s1109_s12   ;;  %s932_s11 = sphi %s969_s11, %s1108_s11   ;;  %s928_s10 = sphi %s967_s10, %s1107_s10   ;;  %s924_s9 = sphi %s965_s9, %s1106_s9  }
   0x5   : > { %p22_p0 = scmp.ge.s32.totalorder %s21_s16, 4  ;;  %s694_s18 = sadd.s32 4294967295, %s948_s15  }
   0x6   : > { %p97_p1 = scmp.ne.s32.totalorder %s928_s10, %s924_s9  ;;  %p98_p2 = scmp.eq.s32.totalorder %s694_s18, 15 }
   0x7   : > { %s1113_s16 = smov (%p22_p0, %s21_s16), 0  ;;  %s1115_s17 = smov (!%p22_p0, %s24_s17), %s944_s14 }
   0x8   : > { %s83_s19 = ssub.s32 %s940_s13, %s1113_s16  ;;  %p26_p3 = scmp.ge.s32.totalorder %s1115_s17, 4 }
   0x9   : > { %p698_p4 = scmp.ge.s32.totalorder %s948_s15, 1  ;;  %p1011_p5 = por %p98_p2, %p97_p1 }
   0xa   : > { %p143_p6 = scmp.lt.s32.totalorder %s948_s15, 17  ;;  %s1117_s17 = smov (%p26_p3, %s1115_s17), 0 }
   0xb   : > { %s82_s21 = ssub.s32 %s944_s14, %s1117_s17  ;;  %s87_s23 = sadd.s32 1, %s928_s10 }
   0xc   : > { %p144_p7 = pnand %p698_p4, %p143_p6  ;;  %s84_s22 = sor.u32 %s83_s19, %s82_s21 }
   0xd   : > { %p85_p8 = scmp.eq.s32.totalorder %s84_s22, 0  ;;  %p173_p9 = scmp.lt.s32.totalorder (!%p144_p7), %s936_s12, 3 }
   0xe   : > { %147 = sbr.rel (%p144_p7) target bundleno = 334 (0x14e), region = 28  ;;  %s702_s25 = sshll.u32 (!%p144_p7), %s932_s11, 6 }
   0xf   : > { %s1022_s24 = scalar_select %p85_p8, %s928_s10, %s87_s23  }
  0x10   : > { %p181_p10 = scmp.lt.s32.totalorder (!%p144_p7), %s702_s25, 255  ;;  %s170_s18 = sand.u32 (!%p144_p7), 1, %s924_s9  }
  0x11   : > { %s699_s19 = sshll.u32 (!%p144_p7), %s170_s18, 5 }
  0x12   : > { %s172_s21 = scalar_lea.vmem (!%p144_p7), [#allocation2], %s699_s19 }
  0x15   : > { %s174_s26 = scalar_select %p173_p9, %s936_s12, 3 }
  0x16   : > { %s1119_s25 = smov (!%p181_p10, %s702_s25), 255  ;;  %s743_s9 = sshll.u32 (%p1011_p5), %s932_s11, 2 }
  0x17   : > { %s703_s27 = sshll.u32 %s174_s26, 8  ;;  %s748_s28 = sshll.u32 %s174_s26, 3 }
  0x18   : > { %s184_s29 = sadd.s32 %s703_s27, %s1119_s25  ;;  %s177_s4 = scalar_lea.vmem %s1102_s0, %s748_s28 }
  0x19   : > { %s704_s5 = sshll.u32 %s184_s29, 2  ;;  %v1030_v0 = vld [vmem:[%s177_s4] sm:$0xff]   ;;  %s744_s22 = sshll.u32 (%p1011_p5), %s936_s12, 5 }
  0x1a   : > { %s1035_s8 = scalar_lea.vmem %s1103_s1, %s704_s5  ;;  %769 = vmatprep.mubr.bf16.mxu0 %v1030_v0  ;;  %787 = vmatprep.mubr.bf16.mxu1 %v1030_v0  ;;  %s585_s23 = sadd.s32 (%p1011_p5), %s744_s22, %s743_s9 }
  0x1b   : > { %v845_v1 = vld [vmem:[%s1035_s8 + $0x40] sm:$0xff]   ;;  %v849_v5 = vld [vmem:[%s1035_s8 + $0x48] sm:$0xff]   ;;  %v853_v9 = vld [vmem:[%s1035_s8 + $0x50] sm:$0xff]   ;;  %s745_s25 = sshll.u32 (%p1011_p5), %s585_s23, 2 }
  0x1c   : > { %v846_v2 = vld [vmem:[%s1035_s8 + $0xc0] sm:$0xff]   ;;  %753 = vmatprep.subr.bf16.mxu0 %v845_v1  ;;  %v850_v6 = vld [vmem:[%s1035_s8 + $0xc8] sm:$0xff]   ;;  %v854_v10 = vld [vmem:[%s1035_s8 + $0xd0] sm:$0xff]   ;;  %s587_s28 = scalar_lea.vmem (%p1011_p5), %s1104_s2, %s745_s25 }
  0x1d   : > { %v847_v3 = vld [vmem:[%s1035_s8] sm:$0xff]   ;;  %771 = vmatprep.subr.bf16.mxu1 %v846_v2  ;;  %v851_v7 = vld [vmem:[%s1035_s8 + $0x8] sm:$0xff]   ;;  %v855_v11 = vld [vmem:[%s1035_s8 + $0x10] sm:$0xff]  }
  0x1e   : > { %v848_v4 = vld [vmem:[%s1035_s8 + $0x80] sm:$0xff]   ;;  %754 = vmatpush3.bf16.xpose.msra.mxu0 %v847_v3  ;;  %v852_v8 = vld [vmem:[%s1035_s8 + $0x88] sm:$0xff]   ;;  %v856_v12 = vld [vmem:[%s1035_s8 + $0x90] sm:$0xff]  }
  0x1f   : > { %772 = vmatpush3.bf16.xpose.msra.mxu1 %v848_v4  ;;  %755 = vmatprep.subr.bf16.mxu0 %v849_v5  ;;  %v857_v13 = vld [vmem:[%s1035_s8 + $0x58] sm:$0xff]   ;;  %v861_v17 = vld [vmem:[%s1035_s8 + $0x60] sm:$0xff]   ;;  %v865_v21 = vld [vmem:[%s1035_s8 + $0x68] sm:$0xff]  }
  0x20   : > { %773 = vmatprep.subr.bf16.mxu1 %v850_v6  ;;  %v858_v14 = vld [vmem:[%s1035_s8 + $0xd8] sm:$0xff]   ;;  %v862_v18 = vld [vmem:[%s1035_s8 + $0xe0] sm:$0xff]   ;;  %v866_v22 = vld [vmem:[%s1035_s8 + $0xe8] sm:$0xff]  }
  0x21   : > { %v859_v15 = vld [vmem:[%s1035_s8 + $0x18] sm:$0xff]   ;;  %v863_v19 = vld [vmem:[%s1035_s8 + $0x20] sm:$0xff]   ;;  %v867_v23 = vld [vmem:[%s1035_s8 + $0x28] sm:$0xff]  }
  0x22   : > { %v860_v16 = vld [vmem:[%s1035_s8 + $0x98] sm:$0xff]   ;;  %v864_v20 = vld [vmem:[%s1035_s8 + $0xa0] sm:$0xff]   ;;  %v868_v24 = vld [vmem:[%s1035_s8 + $0xa8] sm:$0xff]  }
  0x23   : > { %v869_v25 = vld [vmem:[%s1035_s8 + $0x70] sm:$0xff]   ;;  %v873_v29 = vld [vmem:[%s1035_s8 + $0x78] sm:$0xff]  }
  0x24   : > { %v870_v26 = vld [vmem:[%s1035_s8 + $0xf0] sm:$0xff]   ;;  %v874_v30 = vld [vmem:[%s1035_s8 + $0xf8] sm:$0xff]  }
  0x25   : > { %v871_v27 = vld [vmem:[%s1035_s8 + $0x30] sm:$0xff]   ;;  %v875_v31 = vld [vmem:[%s1035_s8 + $0x38] sm:$0xff]  }
  0x26   : > { %756 = vmatpush3.bf16.xpose.msra.mxu0 %v851_v7  ;;  %v872_v28 = vld [vmem:[%s1035_s8 + $0xb0] sm:$0xff]   ;;  %v876_v32 = vld [vmem:[%s1035_s8 + $0xb8] sm:$0xff]  }
  0x27   : > { %774 = vmatpush3.bf16.xpose.msra.mxu1 %v852_v8  ;;  %757 = vmatprep.subr.bf16.mxu0 %v853_v9 }
  0x28   : > { %775 = vmatprep.subr.bf16.mxu1 %v854_v10 }
  0x2e   : > { %758 = vmatpush3.bf16.xpose.msra.mxu0 %v855_v11 }
  0x2f   : > { %776 = vmatpush3.bf16.xpose.msra.mxu1 %v856_v12  ;;  %759 = vmatprep.subr.bf16.mxu0 %v857_v13 }
  0x30   : > { %777 = vmatprep.subr.bf16.mxu1 %v858_v14 }
  0x36   : > { %760 = vmatpush3.bf16.xpose.msra.mxu0 %v859_v15 }
  0x37   : > { %778 = vmatpush3.bf16.xpose.msra.mxu1 %v860_v16  ;;  %761 = vmatprep.subr.bf16.mxu0 %v861_v17 }
  0x38   : > { %779 = vmatprep.subr.bf16.mxu1 %v862_v18 }
  0x3e   : > { %762 = vmatpush3.bf16.xpose.msra.mxu0 %v863_v19 }
  0x3f   : > { %780 = vmatpush3.bf16.xpose.msra.mxu1 %v864_v20  ;;  %763 = vmatprep.subr.bf16.mxu0 %v865_v21 }
  0x40   : > { %781 = vmatprep.subr.bf16.mxu1 %v866_v22 }
  0x46   : > { %764 = vmatpush3.bf16.xpose.msra.mxu0 %v867_v23 }
  0x47   : > { %782 = vmatpush3.bf16.xpose.msra.mxu1 %v868_v24  ;;  %765 = vmatprep.subr.bf16.mxu0 %v869_v25 }
  0x48   : > { %783 = vmatprep.subr.bf16.mxu1 %v870_v26 }
  0x4e   : > { %766 = vmatpush3.bf16.xpose.msra.mxu0 %v871_v27 }
  0x4f   : > { %784 = vmatpush3.bf16.xpose.msra.mxu1 %v872_v28  ;;  %767 = vmatprep.subr.bf16.mxu0 %v873_v29 }
  0x50   : > { %785 = vmatprep.subr.bf16.mxu1 %v874_v30 }
  0x56   : > { %768 = vmatpush3.bf16.xpose.msra.mxu0 %v875_v31 }
  0x57   : > { %786 = vmatpush3.bf16.xpose.msra.mxu1 %v876_v32 }
  0x5d   : > { %770 = vmatmul.mubr.bf16.vlgmr.msra.gmra.mrb[0].mxu0 %v1030_v0 }
  0x5e   : > { %788 = vmatmul.mubr.bf16.vlgmr.msra.gmra.mrb[0].mxu1 %v1030_v0 }
 0x130   : > { %v488_v33 = vpop.f32.mrb[0].mxu0 }
 0x131   : > { %878 = vtanh.f32 %v488_v33  ;;  %v531_v34 = vpop.f32.mrb[0].mxu1  ;;  %v490_v35 = vpop.f32.mrb[1].mxu0 }
 0x132   : > { %880 = vtanh.f32 %v531_v34  ;;  %v533_v36 = vpop.f32.mrb[1].mxu1  ;;  %v492_v37 = vpop.f32.mrb[2].mxu0 }
 0x133   : > { %882 = vtanh.f32 %v490_v35  ;;  %v535_v38 = vpop.f32.mrb[2].mxu1  ;;  %v494_v39 = vpop.f32.mrb[3].mxu0 }
 0x134   : > { %884 = vtanh.f32 %v533_v36  ;;  %v537_v40 = vpop.f32.mrb[3].mxu1 }
 0x135   : > { %886 = vtanh.f32 %v492_v37 }
 0x136   : > { %888 = vtanh.f32 %v535_v38 }
 0x137   : > { %890 = vtanh.f32 %v494_v39 }
 0x138   : > { %892 = vtanh.f32 %v537_v40 }
 0x13b   : > { %v879_v41 = vpop.eup %878 }
 0x13c   : > { %v881_v42 = vpop.eup %880 }
 0x13d   : > { %v883_v43 = vpop.eup %882 }
 0x13e   : > { %v885_v44 = vpop.eup %884  ;;  %v749_v45 = vpack.c.bf16 %v883_v43, %v879_v41 }
 0x13f   : > { %v887_v46 = vpop.eup %886  ;;  %v750_v47 = vpack.c.bf16 %v885_v44, %v881_v42  ;;  %582 = sbr.rel (!%p1011_p5) target bundleno = 334 (0x14e), region = 32 }
 0x140   : > { %v889_v48 = vpop.eup %888  ;;  %572 = vst [vmem:[%s172_s21] sm:$0xff] %v749_v45 }
 0x141   : > { %v891_v49 = vpop.eup %890  ;;  %573 = vst [vmem:[%s172_s21 + $0x8] sm:$0xff] %v750_v47 }
 0x142   : > { %v893_v50 = vpop.eup %892  ;;  %v751_v51 = vpack.c.bf16 %v891_v49, %v887_v46 }
 0x143   : > { %v752_v52 = vpack.c.bf16 %v893_v50, %v889_v48 }
 0x144   : > { %574 = vst [vmem:[%s172_s21 + $0x10] sm:$0xff] %v751_v51 }
 0x145   : > { %575 = vst [vmem:[%s172_s21 + $0x18] sm:$0xff] %v752_v52 }
 0x147   : > { %v600_v53 = vld [vmem:[%s172_s21] sm:$0xff] }
 0x148   : > { %v602_v54 = vld [vmem:[%s172_s21 + $0x8] sm:$0xff]  ;;  %601 = vst [vmem:[%s587_s28] sm:$0xff] %v600_v53 }
 0x149   : > { %603 = vst [vmem:[%s587_s28 + $0x8] sm:$0xff] %v602_v54 }
 0x14b   : > { %v604_v55 = vld [vmem:[%s172_s21 + $0x10] sm:$0xff] }
 0x14c   : > { %v606_v56 = vld [vmem:[%s172_s21 + $0x18] sm:$0xff]  ;;  %605 = vst [vmem:[%s587_s28 + $0x40] sm:$0xff] %v604_v55 }
 0x14d   : > { %607 = vst [vmem:[%s587_s28 + $0x48] sm:$0xff] %v606_v56 }
 0x14e PF: > { %s12_s15 = sadd.s32 1, %s948_s15   ;;  %s1106_s9 = smov %s928_s10 }
 0x14f   : > { %p9_p11 = scmp.ge.s32.totalorder %s12_s15, 18   ;;  %s1107_s10 = smov %s1022_s24 }
 0x150   : > { %s1108_s11 = smov %s940_s13  ;;  %s1109_s12 = smov %s944_s14 }
 0x151   : > { %s1110_s13 = smov %s1113_s16  ;;  %s1111_s14 = smov %s1117_s17 }
 0x152   :  { %11 = sbr.rel (!%p9_p11) target bundleno = 4 (0x4), region = 84 }

</bundles_post_ra>
